<compile_context>
chip_gen: v6e
topology: v6e:2x2x1
jax: 0.10.0
libtpu: 0.0.40
codegen_flags: <defaults>
</compile_context>

<pallas_src>
import math

import jax
import jax.numpy as jnp
from jax.experimental import pallas as pl
from jax.experimental.pallas import tpu as pltpu


_TARGET_BLOCK_BYTES = 1 << 20  # ~1 MiB output tile


def _sinusoidal_kernel(x_ref, table_ref, out_ref):
    # x_ref:     (TN, 1)   f32   timesteps for this tile
    # table_ref: (2, dim)  f32   row 0: [freqs, freqs], row 1: [0.., pi/2..]
    # out_ref:   (TN, dim)       single lane-dense full-width store
    freqs_full = table_ref[0:1, :]
    phase = table_ref[1:2, :]
    out_ref[...] = jnp.sin(x_ref[...] * freqs_full + phase).astype(out_ref.dtype)


def _round_up(a, b):
    return ((a + b - 1) // b) * b


def sinusoidal_pos_emb(x, dim, *, out_dtype=jnp.float32, min_pallas_elems=65536):
    """x: (N,) timesteps -> (N, dim) sinusoidal embedding."""
    assert dim % 2 == 0, "dim must be even (same assumption as the PyTorch module)"
    half_dim = dim // 2
    assert half_dim > 1, "dim must be >= 4 (half_dim-1 appears in a divisor)"

    n = x.shape[0]
    xf = x.astype(jnp.float32)

    scale = -math.log(10000.0) / (half_dim - 1)
    freqs = jnp.exp(jnp.arange(half_dim, dtype=jnp.float32) * scale)

    # Fast path: at typical diffusion-timestep sizes (N=batch, dim=32..128) the
    # output is ~KBs; pallas_call fixed dispatch/DMA cost dominates, so let XLA
    # fuse the plain expression into the surrounding graph.
    if n * dim < min_pallas_elems or n < 8:
        emb = xf[:, None] * freqs[None, :]
        return jnp.concatenate([jnp.sin(emb), jnp.cos(emb)], axis=-1).astype(out_dtype)

    # Lane-dense tables for the single-store formulation.
    freqs_full = jnp.concatenate([freqs, freqs])                       # (dim,)
    phase = jnp.concatenate(
        [jnp.zeros((half_dim,), jnp.float32),
         jnp.full((half_dim,), jnp.pi / 2.0, dtype=jnp.float32)])      # (dim,)
    table = jnp.stack([freqs_full, phase])                             # (2, dim)

    # Row tile sized by bytes (~1 MiB output block), multiple of 8, <= n, and
    # capped at ~n/2 so the grid has >= 2 steps when possible (megacore / v7x).
    out_bytes = jnp.dtype(out_dtype).itemsize
    target_rows = max(8, (_TARGET_BLOCK_BYTES // (dim * out_bytes)) // 8 * 8)
    half_n_rows = _round_up(pl.cdiv(n, 2), 8)
    tn = min(target_rows, half_n_rows, (n // 8) * 8)
    grid = (pl.cdiv(n, tn),)  # ragged last block is masked by Pallas

    x2d = xf.reshape(n, 1)

    return pl.pallas_call(
        _sinusoidal_kernel,
        out_shape=jax.ShapeDtypeStruct((n, dim), out_dtype),
        grid_spec=pltpu.PrefetchScalarGridSpec(
            num_scalar_prefetch=0,
            grid=grid,
            in_specs=[
                pl.BlockSpec((tn, 1), lambda i: (i, 0)),       # timestep tile
                pl.BlockSpec((2, dim), lambda i: (0, 0)),      # constant tables
            ],
            out_specs=pl.BlockSpec((tn, dim), lambda i: (i, 0)),
        ),
        compiler_params=pltpu.CompilerParams(
            dimension_semantics=("parallel",),  # shard N-tiles across TCs
        ),
        cost_estimate=pl.CostEstimate(
            flops=2 * n * dim,                 # mul + phase add per element
            transcendentals=n * dim,           # exactly one sin per element
            bytes_accessed=4 * (n + 2 * dim) + out_bytes * n * dim,
        ),
    )(x2d, table)


def _reference(x, dim):
    half_dim = dim // 2
    emb = math.log(10000.0) / (half_dim - 1)
    emb = jnp.exp(jnp.arange(half_dim, dtype=jnp.float32) * -emb)
    emb = x[:, None].astype(jnp.float32) * emb[None, :]
    return jnp.concatenate([jnp.sin(emb), jnp.cos(emb)], axis=-1)


if __name__ == "__main__":
    key = jax.random.PRNGKey(0)
    k1, k2, k3 = jax.random.split(key, 3)

    # Case 1: typical small diffusion-timestep batch -> fused pure-JAX fast path.
    N1, DIM1 = 8, 32
    x1 = jax.random.uniform(k1, (N1,), jnp.float32, 0.0, 1000.0)
    out1 = jax.block_until_ready(sinusoidal_pos_emb(x1, DIM1))
    ref1 = _reference(x1, DIM1)
    assert out1.shape == (N1, DIM1), out1.shape
    assert jnp.allclose(out1, ref1, atol=1e-5, rtol=1e-5), "mismatch (case 1)"

    # Case 2: force the Pallas path; ragged multi-step grid (tn=152, grid=2).
    N2, DIM2 = 300, 64
    x2 = jax.random.uniform(k2, (N2,), jnp.float32, 0.0, 1000.0)
    out2 = jax.block_until_ready(sinusoidal_pos_emb(x2, DIM2, min_pallas_elems=0))
    ref2 = _reference(x2, DIM2)
    assert out2.shape == (N2, DIM2), out2.shape
    assert jnp.allclose(out2, ref2, atol=1e-4, rtol=1e-4), "mismatch (case 2)"

    # Case 3: larger Pallas case, two ~0.5 MiB output tiles, ragged last block.
    N3, DIM3 = 2056, 128
    x3 = jax.random.uniform(k3, (N3,), jnp.float32, 0.0, 1000.0)
    out3 = jax.block_until_ready(sinusoidal_pos_emb(x3, DIM3))
    ref3 = _reference(x3, DIM3)
    assert out3.shape == (N3, DIM3), out3.shape
    assert jnp.allclose(out3, ref3, atol=1e-4, rtol=1e-4), "mismatch (case 3)"

    print("KERNEL_OK")
</pallas_src>

<mosaic_0001>
module attributes {stable_mosaic.version = 11 : i64} {
  func.func @_sinusoidal_kernel(%arg0: i32, %arg1: memref<152x1xf32, #tpu.memory_space<vmem>>, %arg2: memref<2x64xf32, #tpu.memory_space<vmem>>, %arg3: memref<152x64xf32, #tpu.memory_space<vmem>>) attributes {dimension_semantics = [#tpu.dimension_semantics<parallel>], iteration_bounds = array<i64: 2>, scalar_prefetch = 0 : i64, scratch_operands = 0 : i64, tpu.core_type = #tpu.core_type<tc>, window_params = [{transform_indices = @transform_0, window_bounds = array<i64: 152, 1>}, {pipeline_mode = #tpu.pipeline_mode<synchronous>, transform_indices = @transform_1, window_bounds = array<i64: 2, 64>}, {transform_indices = @transform_2, window_bounds = array<i64: 152, 64>}]} {
    %c0 = arith.constant 0 : index
    %c0_0 = arith.constant 0 : index
    %0 = vector.load %arg2[%c0, %c0_0] : memref<2x64xf32, #tpu.memory_space<vmem>>, vector<1x64xf32>
    %c1 = arith.constant 1 : index
    %c0_1 = arith.constant 0 : index
    %1 = vector.load %arg2[%c1, %c0_1] : memref<2x64xf32, #tpu.memory_space<vmem>>, vector<1x64xf32>
    %c0_2 = arith.constant 0 : index
    %c0_3 = arith.constant 0 : index
    %2 = vector.load %arg1[%c0_2, %c0_3] : memref<152x1xf32, #tpu.memory_space<vmem>>, vector<152x1xf32>
    %3 = vector.broadcast %2 : vector<152x1xf32> to vector<152x64xf32>
    %4 = vector.broadcast %0 : vector<1x64xf32> to vector<152x64xf32>
    %5 = arith.mulf %3, %4 : vector<152x64xf32>
    %6 = vector.broadcast %1 : vector<1x64xf32> to vector<152x64xf32>
    %7 = arith.addf %5, %6 : vector<152x64xf32>
    %8 = math.sin %7 : vector<152x64xf32>
    %c0_4 = arith.constant 0 : index
    %c0_5 = arith.constant 0 : index
    %9 = vector.load %arg3[%c0_4, %c0_5] : memref<152x64xf32, #tpu.memory_space<vmem>>, vector<152x64xf32>
    tpu.vector_store %arg3[%c0_4, %c0_5], %8 {strides = array<i32>} : memref<152x64xf32, #tpu.memory_space<vmem>>, vector<152x64xf32>,
    return
  }
  func.func @transform_0(%arg0: i32) -> (i32, i32) {
    %c0_i32 = arith.constant 0 : i32
    %c0_i32_0 = arith.constant 0 : i32
    return %arg0, %c0_i32 : i32, i32
  }
  func.func @transform_1(%arg0: i32) -> (i32, i32) {
    %c0_i32 = arith.constant 0 : i32
    %c0_i32_0 = arith.constant 0 : i32
    %c0_i32_1 = arith.constant 0 : i32
    return %c0_i32, %c0_i32_0 : i32, i32
  }
  func.func @transform_2(%arg0: i32) -> (i32, i32) {
    %c0_i32 = arith.constant 0 : i32
    %c0_i32_0 = arith.constant 0 : i32
    return %arg0, %c0_i32 : i32, i32
  }
}

</mosaic_0001>

<bundles_post_ra>
// kernel: tpu_custom_call.1
= control target key start
LH: loop header
LB: loop body
LE: loop exit
PB: predicated region body
PF: predicated region fallthrough
CT: control target
= control target key end

     0   :  { %s2651_s9 = smov 0   ;;  %s4142_s0 = inlined_call_operand.vmem [shape: f32[300,1], index: 0, kind: input, shape index: {}]   ;;  %s4143_s1 = inlined_call_operand.vmem [shape: f32[2,64], index: 1, kind: input, shape index: {}]   ;;  %s4144_s2 = inlined_call_operand.vmem [shape: f32[300,64], index: 2, kind: output, shape index: {}]  }
   0x1 LB: > { %s2361_s10 = sadd.s32 4294967295, %s2627_s9   ;;  %p2365_p0 = scmp.ge.s32.totalorder %s2627_s9, 1  ;;  %s2627_s9 = sphi %s2651_s9, %s12_s9  }
   0x2   : > { %p113_p1 = scmp.lt.s32.totalorder %s2627_s9, 3 }
   0x4   : > { %p114_p2 = pnand %p2365_p0, %p113_p1 }
   0x5   : > { %s135_s11 = smul.u32 (!%p114_p2), 19, %s2361_s10 }
   0x6   : > { %117 = sbr.rel (%p114_p2) target bundleno = 657 (0x291), region = 28 }
   0x7   : > { %p136_p3 = scmp.lt.s32.totalorder (!%p114_p2), %s135_s11, 37 }
   0xb   : > { %v2629_v0 = vmov 0   ;;  %s4180_s11 = smov (!%p136_p3, %s135_s11), 37  ;;  %v2691_v20 = vld [vmem:[%s4143_s1] ss:$0 sm:$0xff]  ;;  %v2696_v21 = vld [vmem:[%s4143_s1 + $0x1] ss:$0 sm:$0xff] }
   0xc   : > { %2540 = vset.pattern.permute.xlu1 %v2629_v0  ;;  %2539 = vset.pattern.permute.xlu0 %v2629_v0  ;;  %s2366_s12 = sshll.u32 %s4180_s11, 3  ;;  %v2630_v59 = vmov 683565275   ;;  %v2631_v61 = vmov 2475754826  }
   0xd   : > { %s2667_s15 = scalar_lea.vmem %s4142_s0, %s2366_s12  ;;  %v2632_v63 = vmov 2131351028   ;;  %s2967_s22 = scalar_lea.vmem %s4144_s2, %s2366_s12 }
   0xe   : > { %v151_v1 = vld [vmem:[%s2667_s15 + $0x10] sm:$0xff]  ;;  %v149_v2 = vld [vmem:[%s2667_s15] sm:$0xff]  ;;  %v152_v3 = vld [vmem:[%s2667_s15 + $0x18] sm:$0xff] }
   0xf   : > { %180 = vperm.xlu1 %2540, %v151_v1   ;;  %170 = vperm.xlu0 %2539, %v149_v2   ;;  %v150_v4 = vld [vmem:[%s2667_s15 + $0x8] sm:$0xff]  ;;  %v153_v6 = vld [vmem:[%s2667_s15 + $0x20] sm:$0xff]  ;;  %v156_v7 = vld [vmem:[%s2667_s15 + $0x38] sm:$0xff]  ;;  %v2633_v1 = vmov 2102212464  }
  0x10   : > { %v154_v5 = vld [vmem:[%s2667_s15 + $0x28] sm:$0xff]  ;;  %v155_v8 = vld [vmem:[%s2667_s15 + $0x30] sm:$0xff]  ;;  %v157_v10 = vld [vmem:[%s2667_s15 + $0x40] sm:$0xff] }
  0x11   : > { %v158_v9 = vld [vmem:[%s2667_s15 + $0x48] sm:$0xff]  ;;  %v160_v11 = vld [vmem:[%s2667_s15 + $0x58] sm:$0xff]  ;;  %v159_v12 = vld [vmem:[%s2667_s15 + $0x50] sm:$0xff] }
  0x12   : > { %v162_v13 = vld [vmem:[%s2667_s15 + $0x68] sm:$0xff]  ;;  %v161_v14 = vld [vmem:[%s2667_s15 + $0x60] sm:$0xff]  ;;  %v164_v15 = vld [vmem:[%s2667_s15 + $0x78] sm:$0xff] }
  0x13   : > { %185 = vperm.xlu1 %2540, %v152_v3   ;;  %175 = vperm.xlu0 %2539, %v150_v4   ;;  %v163_v16 = vld [vmem:[%s2667_s15 + $0x70] sm:$0xff]  ;;  %v166_v17 = vld [vmem:[%s2667_s15 + $0x88] sm:$0xff]  ;;  %v165_v18 = vld [vmem:[%s2667_s15 + $0x80] sm:$0xff]  ;;  %v2634_v3 = vmov 920167782  }
  0x14   : > { %v167_v19 = vld [vmem:[%s2667_s15 + $0x90] sm:$0xff] }
  0x17   : > { %195 = vperm.xlu1 %2540, %v154_v5   ;;  %190 = vperm.xlu0 %2539, %v153_v6  }
  0x1b   : > { %205 = vperm.xlu1 %2540, %v156_v7   ;;  %200 = vperm.xlu0 %2539, %v155_v8  }
  0x1f   : > { %215 = vperm.xlu1 %2540, %v158_v9   ;;  %210 = vperm.xlu0 %2539, %v157_v10  }
  0x23   : > { %225 = vperm.xlu1 %2540, %v160_v11   ;;  %220 = vperm.xlu0 %2539, %v159_v12   ;;  %v2635_v12 = vmov 1326507024  }
  0x27   : > { %235 = vperm.xlu1 %2540, %v162_v13   ;;  %230 = vperm.xlu0 %2539, %v161_v14  }
  0x2b   : > { %245 = vperm.xlu1 %2540, %v164_v15   ;;  %240 = vperm.xlu0 %2539, %v163_v16  }
  0x2f   : > { %255 = vperm.xlu1 %2540, %v166_v17   ;;  %250 = vperm.xlu0 %2539, %v165_v18  }
  0x33   : > { %260 = vperm.xlu0 %2539, %v167_v19  }
  0x8a   : > { %v181_v22 = vpop.permute.xlu1 %180  ;;  %v171_v23 = vpop.permute.xlu0 %170 }
  0x8b   : > { %v269_v24 = vmul.f32 %v2691_v20, %v181_v22  ;;  %v267_v25 = vmul.f32 %v2691_v20, %v171_v23 }
  0x8d   : > { %v2701_v26 = vadd.f32 %v2696_v21, %v269_v24  ;;  %v2704_v27 = vadd.f32 %v2696_v21, %v267_v25 }
  0x8e   : > { %v186_v28 = vpop.permute.xlu1 %185  ;;  %v176_v47 = vpop.permute.xlu0 %175 }
  0x8f   : > { %v517_v29 = vand.u32 2147483647, %v2701_v26  ;;  %v520_v30 = vand.u32 2139095040, %v2701_v26  ;;  %v309_v31 = vand.u32 2147483647, %v2704_v27  ;;  %v312_v32 = vand.u32 2139095040, %v2704_v27 }
  0x90   : > { %v270_v35 = vmul.f32 %v2691_v20, %v186_v28  ;;  %v2723_v53 = vmul.f32 %v2691_v20, %v176_v47  ;;  %vm519_vm13 = vcmp.lt.s32.totalorder %v2701_v26, 0  ;;  %vm311_vm14 = vcmp.lt.s32.totalorder %v2704_v27, 0 }
  0x91   : > { %v521_v33 = vshrl.u32 %v520_v30, 23  ;;  %v524_v34 = vand.u32 8388607, %v517_v29  ;;  %v313_v36 = vshrl.u32 %v312_v32, 23  ;;  %v316_v37 = vand.u32 8388607, %v309_v31 }
  0x92   : > { %v2716_v39 = vadd.f32 %v2696_v21, %v270_v35 }
  0x93   : > { %v2378_v38 = vadd.s32 4294967169, %v521_v33  ;;  %v2370_v40 = vadd.s32 4294967169, %v313_v36  ;;  %v525_v41 = vor.u32 8388608, %v524_v34  ;;  %v317_v43 = vor.u32 8388608, %v316_v37 }
  0x94   : > { %v621_v45 = vand.u32 2147483647, %v2716_v39  ;;  %v624_v46 = vand.u32 2139095040, %v2716_v39 }
  0x95   : > { %v527_v42 = vadd.s32 1, %v2378_v38  ;;  %v319_v44 = vadd.s32 1, %v2370_v40  ;;  %v2720_v51 = vshll.u32 %v525_v41, 8  ;;  %v2727_v56 = vshll.u32 %v317_v43, 8 }
  0x96   : > { %v625_v49 = vshrl.u32 %v624_v46, 23  ;;  %v2731_v57 = vand.u32 8388607, %v621_v45 }
  0x97   : > { %vm528_vm0 = vcmp.gt.s32.totalorder %v527_v42, 0  ;;  %vm320_vm1 = vcmp.gt.s32.totalorder %v319_v44, 0 }
  0x98   : > { %v529_v48 = vsel %vm528_vm0, %v527_v42, 0  ;;  %v321_v52 = vsel %vm320_vm1, %v319_v44, 0  ;;  %v2740_v6 = vadd.s32 4294967169, %v625_v49  ;;  %vm2847_vm1 = vcmp.le.f32.partialorder %v517_v29, 0.7853982 }
  0x99   : > { %v531_v50 = vand.u32 31, %v529_v48  ;;  %v530_v54 = vshrl.u32 %v529_v48, 5  ;;  %v2725_v55 = vand.u32 31, %v321_v52  ;;  %v2738_v5 = vshrl.u32 %v321_v52, 5 }
  0x9b   : > { %v532_v58 = vsub.s32 32, %v531_v50  ;;  %v534_v60 = vshll.u32 %v2630_v59, %v531_v50  ;;  %v537_v62 = vshll.u32 %v2631_v61, %v531_v50  ;;  %v540_v0 = vshll.u32 %v2632_v63, %v531_v50 }
  0x9c   : > { %v543_v2 = vshll.u32 %v2633_v1, %v531_v50  ;;  %v546_v4 = vshll.u32 %v2634_v3, %v531_v50  ;;  %vm549_vm2 = vcmp.lt.s32.totalorder %v530_v54, 1  ;;  %vm550_vm3 = vcmp.lt.s32.totalorder %v530_v54, 2 }
  0x9d   : > { %v533_v7 = vshrl.u32 %v2630_v59, %v532_v58  ;;  %v535_v8 = vshrl.u32 %v2631_v61, %v532_v58  ;;  %v538_v9 = vshrl.u32 %v2632_v63, %v532_v58  ;;  %v541_v10 = vshrl.u32 %v2633_v1, %v532_v58 }
  0x9e   : > { %v544_v11 = vshrl.u32 %v2634_v3, %v532_v58  ;;  %v547_v13 = vshrl.u32 %v2635_v12, %v532_v58  ;;  %v324_v17 = vsub.s32 32, %v2725_v55  ;;  %vm551_vm4 = vcmp.lt.s32.totalorder %v530_v54, 3 }
  0x9f   : > { %v536_v14 = vor.u32 %v535_v8, %v534_v60  ;;  %v539_v15 = vor.u32 %v538_v9, %v537_v62  ;;  %v542_v16 = vor.u32 %v541_v10, %v540_v0  ;;  %vm552_vm5 = vcmp.lt.s32.totalorder %v530_v54, 4 }
  0xa0   : > { %v545_v18 = vor.u32 %v544_v11, %v543_v2  ;;  %v548_v19 = vor.u32 %v547_v13, %v546_v4  ;;  %v326_v33 = vshll.u32 %v2630_v59, %v2725_v55  ;;  %v327_v36 = vshrl.u32 %v2631_v61, %v324_v17 }
  0xa1   : > { %v553_v22 = vsel %vm549_vm2, %v533_v7, %v536_v14  ;;  %v554_v23 = vsel %vm552_vm5, %v542_v16, 2102212464  ;;  %v557_v24 = vsel %vm549_vm2, %v536_v14, %v539_v15  ;;  %v561_v25 = vsel %vm549_vm2, %v539_v15, %v542_v16 }
  0xa2   : > { %v555_v28 = vsel %vm551_vm4, %v539_v15, %v554_v23  ;;  %v558_v30 = vsel %vm552_vm5, %v545_v18, 920167782  ;;  %v562_v32 = vsel %vm552_vm5, %v548_v19, 1326507024  ;;  %v329_v37 = vshll.u32 %v2631_v61, %v2725_v55 }
  0xa3   : > { %v559_v34 = vsel %vm551_vm4, %v542_v16, %v558_v30  ;;  %v563_v35 = vsel %vm551_vm4, %v545_v18, %v562_v32  ;;  %v556_v38 = vsel %vm550_vm3, %v553_v22, %v555_v28  ;;  %v330_v42 = vshrl.u32 %v2632_v63, %v324_v17 }
  0xa4   : > { %v560_v40 = vsel %vm550_vm3, %v557_v24, %v559_v34  ;;  %v564_v41 = vsel %vm550_vm3, %v561_v25, %v563_v35  ;;  %v328_v48 = vor.u32 %v327_v36, %v326_v33  ;;  %v332_v50 = vshll.u32 %v2632_v63, %v2725_v55 }
  0xa5   : > { %v2759_v43 = vmul.u32.u64.low %v2720_v51, %v564_v41  ;;  %v2760_v44 = vmul.u32.u64.high %v2720_v51, %v564_v41, %v2759_v43  ;;  %v2763_v46 = vmul.u32.u64.low %v2720_v51, %v560_v40  ;;  %v2764_v47 = vmul.u32.u64.high %v2720_v51, %v560_v40, %v2763_v46 }
  0xa6   : > { %v331_v49 = vor.u32 %v330_v42, %v329_v37  ;;  %v333_v52 = vshrl.u32 %v2633_v1, %v324_v17  ;;  %v325_v54 = vshrl.u32 %v2630_v59, %v324_v17  ;;  %v335_v58 = vshll.u32 %v2633_v1, %v2725_v55 }
  0xa7   : > { %v336_v60 = vshrl.u32 %v2634_v3, %v324_v17  ;;  %v339_v62 = vshrl.u32 %v2635_v12, %v324_v17  ;;  %v572_v0 = vmul.u32 %v2720_v51, %v556_v38  ;;  %v338_v4 = vshll.u32 %v2634_v3, %v2725_v55 }
  0xa8   : > { %v334_v2 = vor.u32 %v333_v52, %v332_v50  ;;  %vm341_vm6 = vcmp.lt.s32.totalorder %v2738_v5, 1  ;;  %vm574_vm7 = vc.u32 %v2760_v44, %v2763_v46  ;;  %v575_v7 = vadd.s32 1, %v2764_v47 }
  0xa9   : > { %v337_v8 = vor.u32 %v336_v60, %v335_v58  ;;  %vm342_vm8 = vcmp.lt.s32.totalorder %v2738_v5, 2  ;;  %v340_v9 = vor.u32 %v339_v62, %v338_v4  ;;  %vm343_vm9 = vcmp.lt.s32.totalorder %v2738_v5, 3 }
  0xaa   : > { %vm344_vm10 = vcmp.lt.s32.totalorder %v2738_v5, 4  ;;  %v349_v10 = vsel %vm341_vm6, %v328_v48, %v331_v49  ;;  %v576_v51 = vsel %vm574_vm7, %v575_v7, %v2764_v47  ;;  %v353_v55 = vsel %vm341_vm6, %v331_v49, %v334_v2 }
  0xab   : > { %v346_v11 = vsel %vm344_vm10, %v334_v2, 2102212464  ;;  %v350_v13 = vsel %vm344_vm10, %v337_v8, 920167782  ;;  %v577_v14 = vadd.s32 %v576_v51, %v572_v0  ;;  %v345_v15 = vsel %vm341_vm6, %v325_v54, %v328_v48 }
  0xac   : > { %v351_v16 = vsel %vm343_vm9, %v334_v2, %v350_v13  ;;  %v354_v17 = vsel %vm344_vm10, %v340_v9, 1326507024  ;;  %v347_v18 = vsel %vm343_vm9, %v331_v49, %v346_v11  ;;  %v631_v23 = vadd.s32 1, %v2740_v6 }
  0xad   : > { %v352_v19 = vsel %vm342_vm8, %v349_v10, %v351_v16  ;;  %v355_v22 = vsel %vm343_vm9, %v337_v8, %v354_v17  ;;  %v578_v24 = vadd.s32 536870912, %v577_v14  ;;  %v348_v35 = vsel %vm342_vm8, %v345_v15, %v347_v18 }
  0xae   : > { %v356_v25 = vsel %vm342_vm8, %v353_v55, %v355_v22  ;;  %v2790_v28 = vmul.u32.u64.low %v2727_v56, %v352_v19  ;;  %v2791_v30 = vmul.u32.u64.high %v2727_v56, %v352_v19, %v2790_v28  ;;  %vm632_vm11 = vcmp.gt.s32.totalorder %v631_v23, 0 }
  0xaf   : > { %v2795_v32 = vmul.u32.u64.low %v2727_v56, %v356_v25  ;;  %v2796_v33 = vmul.u32.u64.high %v2727_v56, %v356_v25, %v2795_v32  ;;  %v579_v34 = vshrl.u32 %v578_v24, 30  ;;  %v633_v36 = vsel %vm632_vm11, %v631_v23, 0 }
  0xb0   : > { %v2802_v6 = vadd.f32 %v2696_v21, %v2723_v53  ;;  %v635_v37 = vand.u32 31, %v633_v36  ;;  %v367_v40 = vadd.s32 1, %v2791_v30  ;;  %v629_v41 = vor.u32 8388608, %v2731_v57 }
  0xb1   : > { %v580_v38 = vshll.u32 %v579_v34, 30  ;;  %v364_v42 = vmul.u32 %v2727_v56, %v348_v35  ;;  %vm366_vm12 = vc.u32 %v2796_v33, %v2790_v28  ;;  %v573_v49 = vadd.s32 %v2763_v46, %v2760_v44 }
  0xb2   : > { %v636_v43 = vsub.s32 32, %v635_v37  ;;  %v368_v5 = vsel %vm366_vm12, %v367_v40, %v2791_v30  ;;  %v413_v48 = vand.u32 2147483647, %v2802_v6  ;;  %v2816_v57 = vshll.u32 %v629_v41, 8 }
  0xb3   : > { %v2809_v47 = vsub.s32 %v577_v14, %v580_v38  ;;  %v369_v53 = vadd.s32 %v368_v5, %v364_v42  ;;  %v2818_v52 = vshrl.u32 %v633_v36, 5  ;;  %v416_v58 = vand.u32 2139095040, %v2802_v6 }
  0xb4   : > { %v639_v54 = vshrl.u32 %v2631_v61, %v636_v43  ;;  %v642_v62 = vshrl.u32 %v2632_v63, %v636_v43  ;;  %v645_v0 = vshrl.u32 %v2633_v1, %v636_v43  ;;  %v2827_v44 = vand.u32 8388607, %v413_v48 }
  0xb5   : > { %v583_v50 = vsub.s32 0, %v2809_v47  ;;  %v370_v56 = vadd.s32 536870912, %v369_v53  ;;  %v603_v46 = vsub.s32 4, %v579_v34  ;;  %v638_v4 = vshll.u32 %v2630_v59, %v635_v37 }
  0xb6   : > { %v648_v7 = vshrl.u32 %v2634_v3, %v636_v43  ;;  %v641_v9 = vshll.u32 %v2631_v61, %v635_v37  ;;  %v644_v10 = vshll.u32 %v2632_v63, %v635_v37  ;;  %v651_v51 = vshrl.u32 %v2635_v12, %v636_v43 }
  0xb7   : > { %v2379_v60 = vmin.u32 %v583_v50, %v2809_v47  ;;  %v371_v2 = vshrl.u32 %v370_v56, 30  ;;  %v640_v13 = vor.u32 %v639_v54, %v638_v4  ;;  %v647_v55 = vshll.u32 %v2633_v1, %v635_v37 }
  0xb8   : > { %v417_v14 = vshrl.u32 %v416_v58, 23  ;;  %v643_v16 = vor.u32 %v642_v62, %v641_v9  ;;  %v646_v17 = vor.u32 %v645_v0, %v644_v10  ;;  %v650_v18 = vshll.u32 %v2634_v3, %v635_v37 }
  0xb9   : > { %v585_v8 = vclz %v2379_v60  ;;  %v372_v11 = vshll.u32 %v371_v2, 30  ;;  %v2838_v19 = vsel %vm519_vm13, %v603_v46, %v579_v34  ;;  %v637_v23 = vshrl.u32 %v2630_v59, %v636_v43 }
  0xba   : > { %v649_v24 = vor.u32 %v648_v7, %v647_v55  ;;  %v395_v25 = vsub.s32 4, %v371_v2  ;;  %v652_v30 = vor.u32 %v651_v51, %v650_v18  ;;  %vm653_vm0 = vcmp.lt.s32.totalorder %v2818_v52, 1 }
  0xbb   : > { %v2380_v15 = vadd.s32 4294967294, %v585_v8  ;;  %v2841_v22 = vsub.s32 %v369_v53, %v372_v11  ;;  %vm655_vm2 = vcmp.lt.s32.totalorder %v2818_v52, 3  ;;  %vm656_vm3 = vcmp.lt.s32.totalorder %v2818_v52, 4 }
  0xbc   : > { %vm2856_vm4 = vcmp.le.f32.partialorder %v309_v31, 0.7853982  ;;  %v658_v40 = vsel %vm656_vm3, %v646_v17, 2102212464  ;;  %v661_v29 = vsel %vm653_vm0, %v640_v13, %v643_v16  ;;  %v662_v43 = vsel %vm656_vm3, %v649_v24, 920167782 }
  0xbd   : > { %vm2381_vm15 = vcmp.lt.s32.totalorder %v2380_v15, 0  ;;  %v375_v35 = vsub.s32 0, %v2841_v22  ;;  %v665_v5 = vsel %vm653_vm0, %v643_v16, %v646_v17  ;;  %v663_v31 = vsel %vm655_vm2, %v646_v17, %v662_v43 }
  0xbe   : > { %v588_v34 = vsel %vm2381_vm15, 0, %v2380_v15  ;;  %v666_v56 = vsel %vm656_vm3, %v652_v30, 1326507024  ;;  %vm654_vm5 = vcmp.lt.s32.totalorder %v2818_v52, 2  ;;  %v657_v58 = vsel %vm653_vm0, %v637_v23, %v640_v13  ;;  %v196_v30 = vpop.permute.xlu1 %195 }
  0xbf   : > { %v589_v36 = vsub.s32 32, %v588_v34  ;;  %v593_v37 = vsub.s32 4294967266, %v588_v34  ;;  %v590_v41 = vshll.u32 %v2809_v47, %v588_v34  ;;  %v2371_v42 = vmin.u32 %v375_v35, %v2841_v22 }
  0xc0   : > { %v659_v47 = vsel %vm655_vm2, %v643_v16, %v658_v40  ;;  %v664_v0 = vsel %vm654_vm5, %v661_v29, %v663_v31  ;;  %v396_v10 = vsel %vm311_vm14, %v395_v25, %v371_v2  ;;  %v365_v13 = vadd.s32 %v2790_v28, %v2796_v33 }
  0xc1   : > { %v591_v53 = vshrl.u32 %v573_v49, %v589_v36  ;;  %v594_v50 = vadd.s32 127, %v593_v37  ;;  %v377_v54 = vclz %v2371_v42  ;;  %v667_v49 = vsel %vm655_vm2, %v649_v24, %v666_v56 }
  0xc2   : > { %v668_v4 = vsel %vm654_vm5, %v665_v5, %v667_v49  ;;  %v2876_v7 = vmul.u32.u64.low %v2816_v57, %v664_v0  ;;  %v2877_v8 = vmul.u32.u64.high %v2816_v57, %v664_v0, %v2876_v7  ;;  %v660_v52 = vsel %vm654_vm5, %v657_v58, %v659_v47 }
  0xc3   : > { %v592_v60 = vor.u32 %v591_v53, %v590_v41  ;;  %v595_v62 = vshll.u32 %v594_v50, 23  ;;  %v2372_v46 = vadd.s32 4294967294, %v377_v54  ;;  %v2374_v55 = vadd.s32 4294967169, %v417_v14  ;;  %v191_v53 = vpop.permute.xlu0 %190 }
  0xc4   : > { %v2882_v51 = vmul.u32.u64.low %v2816_v57, %v668_v4  ;;  %v2883_v11 = vmul.u32.u64.high %v2816_v57, %v668_v4, %v2882_v51  ;;  %v606_v17 = vsel %vm2847_vm1, 0, %v2838_v19  ;;  %v398_v2 = vsel %vm2856_vm4, 0, %v396_v10 }
  0xc5   : > { %v596_v9 = vor.u32 4788187, %v595_v62  ;;  %vm2373_vm6 = vcmp.lt.s32.totalorder %v2372_v46, 0  ;;  %v599_v16 = vcvt.s32.f32 %v592_v60  ;;  %v679_v25 = vadd.s32 1, %v2877_v8 }
  0xc6   : > { %v380_v18 = vsel %vm2373_vm6, 0, %v2372_v46  ;;  %v676_v28 = vmul.u32 %v2816_v57, %v660_v52  ;;  %vm678_vm7 = vc.u32 %v2883_v11, %v2876_v7  ;;  %v423_v33 = vadd.s32 1, %v2374_v55 }
  0xc7   : > { %v597_v15 = vand.u32 2147483647, %v596_v9  ;;  %v381_v23 = vsub.s32 32, %v380_v18  ;;  %v385_v24 = vsub.s32 4294967266, %v380_v18  ;;  %v382_v14 = vshll.u32 %v2841_v22, %v380_v18 }
  0xc8   : > { %v680_v19 = vsel %vm678_vm7, %v679_v25, %v2877_v8  ;;  %vm424_vm8 = vcmp.gt.s32.totalorder %v423_v33, 0  ;;  %v272_v29 = vmul.f32 %v2691_v20, %v196_v30  ;;  %v610_v41 = vadd.s32 3, %v606_v17 }
  0xc9   : > { %v600_v34 = vmul.f32 %v599_v16, %v597_v15  ;;  %v383_v35 = vshrl.u32 %v365_v13, %v381_v23  ;;  %v386_v36 = vadd.s32 127, %v385_v24  ;;  %v681_v40 = vadd.s32 %v680_v19, %v676_v28 }
  0xca   : > { %v425_v5 = vsel %vm424_vm8, %v423_v33, 0  ;;  %v402_v50 = vadd.s32 3, %v398_v2  ;;  %v421_v58 = vor.u32 8388608, %v2827_v44  ;;  %v2905_v62 = vmul.f32 %v2691_v20, %v191_v53 }
  0xcb   : > { %v601_v37 = vxor.u32 2147483648, %v600_v34  ;;  %v384_v42 = vor.u32 %v383_v35, %v382_v14  ;;  %v387_v43 = vshll.u32 %v386_v36, 23  ;;  %v682_v31 = vadd.s32 536870912, %v681_v40 }
  0xcc   : > { %v427_v22 = vand.u32 31, %v425_v5  ;;  %v2907_v0 = vand.u32 3, %v610_v41  ;;  %vm623_vm9 = vcmp.lt.s32.totalorder %v2716_v39, 0  ;;  %v2910_v4 = vand.u32 3, %v402_v50 }
  0xcd   : > { %v602_v57 = vsel %vm519_vm13, %v601_v37, %v600_v34  ;;  %v388_v54 = vor.u32 4788187, %v387_v43  ;;  %v683_v47 = vshrl.u32 %v682_v31, 30  ;;  %v391_v46 = vcvt.s32.f32 %v384_v42 }
  0xce   : > { %v605_v56 = vsel %vm2847_vm1, %v2701_v26, %v602_v57  ;;  %v428_v60 = vsub.s32 32, %v427_v22  ;;  %v2913_v32 = vadd.s32 %v2876_v7, %v2883_v11  ;;  %v2916_v44 = vadd.f32 %v2696_v21, %v272_v29 }
  0xcf   : > { %2541 = vcosq.f32 %v605_v56  ;;  %v389_v49 = vand.u32 2147483647, %v388_v54  ;;  %v684_v8 = vshll.u32 %v683_v47, 30  ;;  %v436_v10 = vshll.u32 %v2632_v63, %v427_v22 }
  0xd0   : > { %2543 = vsinq.f32 %v605_v56  ;;  %v437_v51 = vshrl.u32 %v2633_v1, %v428_v60  ;;  %v2920_v13 = vshll.u32 %v421_v58, 8  ;;  %v431_v55 = vshrl.u32 %v2631_v61, %v428_v60 }
  0xd1   : > { %v392_v9 = vmul.f32 %v391_v46, %v389_v49  ;;  %v2922_v52 = vsub.s32 %v681_v40, %v684_v8  ;;  %v434_v15 = vshrl.u32 %v2632_v63, %v428_v60  ;;  %v440_v7 = vshrl.u32 %v2634_v3, %v428_v60 }
  0xd2   : > { %v2927_v16 = vshrl.u32 %v425_v5, 5  ;;  %v430_v17 = vshll.u32 %v2630_v59, %v427_v22  ;;  %v439_v18 = vshll.u32 %v2633_v1, %v427_v22  ;;  %v707_v24 = vsub.s32 4, %v683_v47 }
  0xd3   : > { %v393_v11 = vxor.u32 2147483648, %v392_v9  ;;  %v687_v23 = vsub.s32 0, %v2922_v52  ;;  %v433_v2 = vshll.u32 %v2631_v61, %v427_v22  ;;  %v438_v25 = vor.u32 %v437_v51, %v436_v10 }
  0xd4   : > { %vm616_vm10 = vcmp.eq.s32.totalorder %v2907_v0, 2  ;;  %v441_v34 = vor.u32 %v440_v7, %v439_v18  ;;  %v442_v28 = vshll.u32 %v2634_v3, %v427_v22  ;;  %v443_v33 = vshrl.u32 %v2635_v12, %v428_v60 }
  0xd5   : > { %v394_v30 = vsel %vm311_vm14, %v393_v11, %v392_v9  ;;  %vm613_vm11 = vcmp.eq.s32.totalorder %v2907_v0, 0  ;;  %v2383_v35 = vmin.u32 %v687_v23, %v2922_v52  ;;  %v432_v36 = vor.u32 %v431_v55, %v430_v17 }
  0xd6   : > { %v397_v14 = vsel %vm2856_vm4, %v2704_v27, %v394_v30  ;;  %v435_v19 = vor.u32 %v434_v15, %v433_v2  ;;  %vm2285_vm12 = vcmask 523264   ;;  %vm612_vm13 = vcmp.lt.s32.totalorder %v2907_v0, 2 }
  0xd7   : > { %2545 = vcosq.f32 %v397_v14  ;;  %v429_v37 = vshrl.u32 %v2630_v59, %v428_v60  ;;  %v444_v40 = vor.u32 %v443_v33, %v442_v28  ;;  %v829_v29 = vand.u32 2147483647, %v2916_v44 }
  0xd8   : > { %vm609_vm14 = vweird.f32 %v2701_v26  ;;  %2547 = vsinq.f32 %v397_v14  ;;  %v689_v41 = vclz %v2383_v35  ;;  %v2949_v38 = vsel %vm623_vm9, %v707_v24, %v683_v47 }
  0xd9   : > { %vm448_vm15 = vcmp.lt.s32.totalorder %v2927_v16, 4  ;;  %vm445_vm0 = vcmp.lt.s32.totalorder %v2927_v16, 1  ;;  %vm446_vm1 = vcmp.lt.s32.totalorder %v2927_v16, 2  ;;  %vm447_vm2 = vcmp.lt.s32.totalorder %v2927_v16, 3 }
  0xda   : > { %v450_v42 = vsel %vm448_vm15, %v438_v25, 2102212464  ;;  %v454_v43 = vsel %vm448_vm15, %v441_v34, 920167782  ;;  %v2384_v5 = vadd.s32 4294967294, %v689_v41  ;;  %v449_v53 = vsel %vm445_vm0, %v429_v37, %v432_v36 }
  0xdb   : > { %v457_v57 = vsel %vm445_vm0, %v435_v19, %v438_v25  ;;  %v453_v31 = vsel %vm445_vm0, %v432_v36, %v435_v19  ;;  %v455_v22 = vsel %vm447_vm2, %v438_v25, %v454_v43  ;;  %v458_v56 = vsel %vm448_vm15, %v444_v40, 1326507024 }
  0xdc   : > { %v2542_v50 = vpop.eup %2541  ;;  %v832_v54 = vand.u32 2139095040, %v2916_v44  ;;  %vm2385_vm3 = vcmp.lt.s32.totalorder %v2384_v5, 0  ;;  %v451_v60 = vsel %vm447_vm2, %v435_v19, %v450_v42  ;;  %v459_v49 = vsel %vm447_vm2, %v441_v34, %v458_v56 }
  0xdd   : > { %v2544_v58 = vpop.eup %2543  ;;  %v617_v47 = vxor.u32 2147483648, %v2542_v50  ;;  %v692_v8 = vsel %vm2385_vm3, 0, %v2384_v5  ;;  %v460_v9 = vsel %vm446_vm1, %v457_v57, %v459_v49  ;;  %v456_v7 = vsel %vm446_vm1, %v453_v31, %v455_v22 }
  0xde   : > { %v614_v46 = vxor.u32 2147483648, %v2544_v58  ;;  %v833_v10 = vshrl.u32 %v832_v54, 23  ;;  %v693_v55 = vsub.s32 32, %v692_v8  ;;  %v697_v15 = vsub.s32 4294967266, %v692_v8 }
  0xdf   : > { %v618_v51 = vsel %vm616_vm10, %v617_v47, %v2544_v58  ;;  %v2972_v17 = vmul.u32.u64.low %v2920_v13, %v460_v9  ;;  %v2973_v18 = vmul.u32.u64.high %v2920_v13, %v460_v9, %v2972_v17  ;;  %v694_v2 = vshll.u32 %v2922_v52, %v692_v8 }
  0xe0   : > { %v615_v11 = vsel %vm613_vm11, %v2542_v50, %v614_v46  ;;  %v2390_v23 = vadd.s32 4294967169, %v833_v10  ;;  %v695_v25 = vshrl.u32 %v2913_v32, %v693_v55  ;;  %v698_v30 = vadd.s32 127, %v697_v15 }
  0xe1   : > { %v619_v24 = vsel %vm612_vm13, %v615_v11, %v618_v51  ;;  %vm401_vm4 = vweird.f32 %v2704_v27  ;;  %v2983_v28 = vmul.u32.u64.low %v2920_v13, %v456_v7  ;;  %v2984_v33 = vmul.u32.u64.high %v2920_v13, %v456_v7, %v2983_v28 }
  0xe2   : > { %v620_v34 = vsel %vm609_vm14, nan, %v619_v24  ;;  %v839_v14 = vadd.s32 1, %v2390_v23  ;;  %vm404_vm5 = vcmp.lt.s32.totalorder %v2910_v4, 2  ;;  %vm2992_vm6 = vcmp.le.f32.partialorder %v621_v45, 0.7853982 }
  0xe3   : > { %2288 = vst.msk [vmem:[%s2967_s22 + $0x10] sm:$0xff] %vm2285_vm12, %v620_v34  ;;  %v696_v26 = vor.u32 %v695_v25, %v694_v2  ;;  %v699_v32 = vshll.u32 %v698_v30, 23  ;;  %vm405_vm7 = vcmp.eq.s32.totalorder %v2910_v4, 0  ;;  %v710_v52 = vsel %vm2992_vm6, 0, %v2949_v38 }
  0xe4   : > { %v452_v35 = vsel %vm446_vm1, %v449_v53, %v451_v60  ;;  %vm840_vm8 = vcmp.gt.s32.totalorder %v839_v14, 0  ;;  %v2546_v36 = vpop.eup %2545  ;;  %vm470_vm10 = vc.u32 %v2973_v18, %v2983_v28  ;;  %v836_v45 = vand.u32 8388607, %v829_v29 }
  0xe5   : > { %v700_v19 = vor.u32 4788187, %v699_v32  ;;  %v841_v37 = vsel %vm840_vm8, %v839_v14, 0  ;;  %v2548_v40 = vpop.eup %2547  ;;  %vm408_vm11 = vcmp.eq.s32.totalorder %v2910_v4, 2  ;;  %v409_v41 = vxor.u32 2147483648, %v2546_v36 }
  0xe6   : > { %v471_v42 = vadd.s32 1, %v2984_v33  ;;  %v843_v38 = vand.u32 31, %v841_v37  ;;  %v406_v43 = vxor.u32 2147483648, %v2548_v40  ;;  %v703_v5 = vcvt.s32.f32 %v696_v26 }
  0xe7   : > { %v701_v16 = vand.u32 2147483647, %v700_v19  ;;  %v468_v53 = vmul.u32 %v2920_v13, %v452_v35  ;;  %v410_v57 = vsel %vm408_vm11, %v409_v41, %v2548_v40  ;;  %v714_v50 = vadd.s32 3, %v710_v52 }
  0xe8   : > { %v472_v31 = vsel %vm470_vm10, %v471_v42, %v2984_v33  ;;  %v844_v22 = vsub.s32 32, %v843_v38  ;;  %v407_v56 = vsel %vm405_vm7, %v2546_v36, %v406_v43  ;;  %v837_v47 = vor.u32 8388608, %v836_v45 }
  0xe9   : > { %v704_v54 = vmul.f32 %v703_v5, %v701_v16  ;;  %v473_v58 = vadd.s32 %v472_v31, %v468_v53  ;;  %v411_v60 = vsel %vm404_vm5, %v407_v56, %v410_v57  ;;  %v846_v49 = vshll.u32 %v2630_v59, %v843_v38 }
  0xea   : > { %v847_v46 = vshrl.u32 %v2631_v61, %v844_v22  ;;  %v850_v13 = vshrl.u32 %v2632_v63, %v844_v22  ;;  %v412_v8 = vsel %vm401_vm4, nan, %v411_v60  ;;  %v842_v51 = vshrl.u32 %v841_v37, 5 }
  0xeb   : > { %v705_v9 = vxor.u32 2147483648, %v704_v54  ;;  %v474_v10 = vadd.s32 536870912, %v473_v58  ;;  %2286 = vst.msk [vmem:[%s2967_s22] sm:$0xff] %vm2285_vm12, %v412_v8  ;;  %v849_v15 = vshll.u32 %v2631_v61, %v843_v38  ;;  %v852_v4 = vshll.u32 %v2632_v63, %v843_v38 }
  0xec   : > { %v848_v55 = vor.u32 %v847_v46, %v846_v49  ;;  %v853_v7 = vshrl.u32 %v2633_v1, %v844_v22  ;;  %v855_v23 = vshll.u32 %v2633_v1, %v843_v38  ;;  %v856_v27 = vshrl.u32 %v2634_v3, %v844_v22 }
  0xed   : > { %v706_v11 = vsel %vm623_vm9, %v705_v9, %v704_v54  ;;  %v475_v17 = vshrl.u32 %v474_v10, 30  ;;  %v851_v2 = vor.u32 %v850_v13, %v849_v15  ;;  %v858_v25 = vshll.u32 %v2634_v3, %v843_v38 }
  0xee   : > { %v709_v24 = vsel %vm2992_vm6, %v2716_v39, %v706_v11  ;;  %v859_v30 = vshrl.u32 %v2635_v12, %v844_v22  ;;  %v854_v33 = vor.u32 %v853_v7, %v852_v4  ;;  %v857_v14 = vor.u32 %v856_v27, %v855_v23 }
  0xef   : > { %2549 = vcosq.f32 %v709_v24  ;;  %v476_v34 = vshll.u32 %v475_v17, 30  ;;  %vm861_vm9 = vcmp.lt.s32.totalorder %v842_v51, 1  ;;  %vm864_vm13 = vcmp.lt.s32.totalorder %v842_v51, 4 }
  0xf0   : > { %2551 = vsinq.f32 %v709_v24  ;;  %v860_v26 = vor.u32 %v859_v30, %v858_v25  ;;  %v3037_v52 = vadd.f32 %v2696_v21, %v2905_v62  ;;  %v3039_v0 = vand.u32 3, %v714_v50 }
  0xf1   : > { %v3033_v32 = vsub.s32 %v473_v58, %v476_v34  ;;  %vm863_vm14 = vcmp.lt.s32.totalorder %v842_v51, 3  ;;  %v869_v35 = vsel %vm861_vm9, %v848_v55, %v851_v2  ;;  %v870_v36 = vsel %vm864_vm13, %v857_v14, 920167782 }
  0xf2   : > { %vm862_vm15 = vcmp.lt.s32.totalorder %v842_v51, 2  ;;  %v871_v45 = vsel %vm863_vm14, %v854_v33, %v870_v36  ;;  %v877_v37 = vshll.u32 %v837_v47, 8  ;;  %v866_v40 = vsel %vm864_vm13, %v854_v33, 2102212464 }
  0xf3   : > { %v479_v19 = vsub.s32 0, %v3033_v32  ;;  %v872_v41 = vsel %vm862_vm15, %v869_v35, %v871_v45  ;;  %v873_v42 = vsel %vm861_vm9, %v851_v2, %v854_v33  ;;  %v874_v38 = vsel %vm864_vm13, %v860_v26, 1326507024 }
  0xf4   : > { %v499_v43 = vsub.s32 4, %v475_v17  ;;  %v845_v16 = vshrl.u32 %v2630_v59, %v844_v22  ;;  %v875_v5 = vsel %vm863_vm14, %v857_v14, %v874_v38  ;;  %v728_v31 = vand.u32 2139095040, %v3037_v52  ;;  %v206_v14 = vpop.permute.xlu1 %205 }
  0xf5   : > { %v2375_v62 = vmin.u32 %v479_v19, %v3033_v32  ;;  %v876_v53 = vsel %vm862_vm15, %v873_v42, %v875_v5  ;;  %v3050_v57 = vmul.u32.u64.low %v877_v37, %v872_v41  ;;  %v3051_v50 = vmul.u32.u64.high %v877_v37, %v872_v41, %v3050_v57 }
  0xf6   : > { %v865_v54 = vsel %vm861_vm9, %v845_v16, %v848_v55  ;;  %v867_v58 = vsel %vm863_vm14, %v851_v2, %v866_v40  ;;  %vm415_vm0 = vcmp.lt.s32.totalorder %v2802_v6, 0  ;;  %v729_v22 = vshrl.u32 %v728_v31, 23 }
  0xf7   : > { %v481_v56 = vclz %v2375_v62  ;;  %v3058_v47 = vmul.u32.u64.low %v877_v37, %v876_v53  ;;  %v3059_v60 = vmul.u32.u64.high %v877_v37, %v876_v53, %v3058_v47  ;;  %vm713_vm1 = vweird.f32 %v2716_v39 }
  0xf8   : > { %vm716_vm2 = vcmp.lt.s32.totalorder %v3039_v0, 2  ;;  %vm3065_vm3 = vcmp.le.f32.partialorder %v413_v48, 0.7853982  ;;  %v500_v13 = vsel %vm415_vm0, %v499_v43, %v475_v17  ;;  %vm717_vm4 = vcmp.eq.s32.totalorder %v3039_v0, 0 }
  0xf9   : > { %v2376_v46 = vadd.s32 4294967294, %v481_v56  ;;  %v868_v8 = vsel %vm862_vm15, %v865_v54, %v867_v58  ;;  %v887_v9 = vadd.s32 1, %v3051_v50  ;;  %v2386_v10 = vadd.s32 4294967169, %v729_v22 }
  0xfa   : > { %vm720_vm5 = vcmp.eq.s32.totalorder %v3039_v0, 2  ;;  %v469_v55 = vadd.s32 %v2983_v28, %v2973_v18  ;;  %v725_v48 = vand.u32 2147483647, %v3037_v52  ;;  %v502_v7 = vsel %vm3065_vm3, 0, %v500_v13 }
  0xfb   : > { %vm2377_vm6 = vcmp.lt.s32.totalorder %v2376_v46, 0  ;;  %vm886_vm7 = vc.u32 %v3059_v60, %v3050_v57  ;;  %v735_v51 = vadd.s32 1, %v2386_v10  ;;  %v884_v24 = vmul.u32 %v877_v37, %v868_v8 }
  0xfc   : > { %v2550_v15 = vpop.eup %2549  ;;  %v484_v4 = vsel %vm2377_vm6, 0, %v2376_v46  ;;  %v888_v28 = vsel %vm886_vm7, %v887_v9, %v3051_v50  ;;  %v506_v35 = vadd.s32 3, %v502_v7  ;;  %v732_v36 = vand.u32 8388607, %v725_v48 }
  0xfd   : > { %v2552_v11 = vpop.eup %2551  ;;  %v721_v17 = vxor.u32 2147483648, %v2550_v15  ;;  %v485_v23 = vsub.s32 32, %v484_v4  ;;  %v489_v27 = vsub.s32 4294967266, %v484_v4  ;;  %v486_v18 = vshll.u32 %v3033_v32, %v484_v4 }
  0xfe   : > { %v718_v2 = vxor.u32 2147483648, %v2552_v11  ;;  %vm736_vm8 = vcmp.gt.s32.totalorder %v735_v51, 0  ;;  %v889_v33 = vadd.s32 %v888_v28, %v884_v24  ;;  %v274_v38 = vmul.f32 %v2691_v20, %v206_v14 }
  0xff   : > { %v722_v25 = vsel %vm720_vm5, %v721_v17, %v2552_v11  ;;  %v487_v30 = vshrl.u32 %v469_v55, %v485_v23  ;;  %v490_v34 = vadd.s32 127, %v489_v27  ;;  %v737_v19 = vsel %vm736_vm8, %v735_v51, 0 }
 0x100   : > { %v719_v26 = vsel %vm717_vm4, %v2550_v15, %v718_v2  ;;  %v890_v40 = vadd.s32 536870912, %v889_v33  ;;  %v739_v42 = vand.u32 31, %v737_v19  ;;  %v733_v16 = vor.u32 8388608, %v732_v36 }
 0x101   : > { %v723_v32 = vsel %vm716_vm2, %v719_v26, %v722_v25  ;;  %v488_v45 = vor.u32 %v487_v30, %v486_v18  ;;  %v491_v37 = vshll.u32 %v490_v34, 23  ;;  %v3099_v0 = vand.u32 3, %v506_v35 }
 0x102   : > { %v724_v41 = vsel %vm713_vm1, nan, %v723_v32  ;;  %v3097_v43 = vshrl.u32 %v890_v40, 30  ;;  %v740_v5 = vsub.s32 32, %v739_v42  ;;  %v3106_v20 = vadd.f32 %v2696_v21, %v274_v38 }
 0x103   : > { %2289 = vst.msk [vmem:[%s2967_s22 + $0x18] sm:$0xff] %vm2285_vm12, %v724_v41  ;;  %v492_v62 = vor.u32 4788187, %v491_v37  ;;  %v495_v50 = vcvt.s32.f32 %v488_v45  ;;  %v742_v22 = vshll.u32 %v2630_v59, %v739_v42  ;;  %v738_v13 = vshrl.u32 %v737_v19, 5 }
 0x104   : > { %v892_v31 = vshll.u32 %v3097_v43, 30  ;;  %v743_v56 = vshrl.u32 %v2631_v61, %v740_v5  ;;  %v746_v39 = vshrl.u32 %v2632_v63, %v740_v5  ;;  %v749_v54 = vshrl.u32 %v2633_v1, %v740_v5 }
 0x105   : > { %v493_v53 = vand.u32 2147483647, %v492_v62  ;;  %v752_v46 = vshrl.u32 %v2634_v3, %v740_v5  ;;  %v745_v8 = vshll.u32 %v2631_v61, %v739_v42  ;;  %v748_v9 = vshll.u32 %v2632_v63, %v739_v42 }
 0x106   : > { %v3108_v47 = vsub.s32 %v889_v33, %v892_v31  ;;  %v3114_v10 = vshll.u32 %v733_v16, 8  ;;  %v744_v4 = vor.u32 %v743_v56, %v742_v22  ;;  %v751_v21 = vshll.u32 %v2633_v1, %v739_v42  ;;  %v201_v22 = vpop.permute.xlu0 %200 }
 0x107   : > { %v496_v58 = vmul.f32 %v495_v50, %v493_v53  ;;  %v747_v7 = vor.u32 %v746_v39, %v745_v8  ;;  %v750_v51 = vor.u32 %v749_v54, %v748_v9  ;;  %v754_v11 = vshll.u32 %v2634_v3, %v739_v42 }
 0x108   : > { %v895_v15 = vsub.s32 0, %v3108_v47  ;;  %v755_v17 = vshrl.u32 %v2635_v12, %v740_v5  ;;  %v753_v24 = vor.u32 %v752_v46, %v751_v21  ;;  %v1040_v2 = vand.u32 2139095040, %v3106_v20 }
 0x109   : > { %v497_v55 = vxor.u32 2147483648, %v496_v58  ;;  %v915_v28 = vsub.s32 4, %v3097_v43  ;;  %v741_v25 = vshrl.u32 %v2630_v59, %v740_v5  ;;  %vm831_vm10 = vcmp.lt.s32.totalorder %v2916_v44, 0 }
 0x10a   : > { %v2391_v27 = vmin.u32 %v895_v15, %v3108_v47  ;;  %v756_v30 = vor.u32 %v755_v17, %v754_v11  ;;  %vm757_vm11 = vcmp.lt.s32.totalorder %v738_v13, 1  ;;  %vm760_vm9 = vcmp.lt.s32.totalorder %v738_v13, 4 }
 0x10b   : > { %v498_v23 = vsel %vm415_vm0, %v497_v55, %v496_v58  ;;  %vm758_vm13 = vcmp.lt.s32.totalorder %v738_v13, 2  ;;  %v762_v33 = vsel %vm760_vm9, %v750_v51, 2102212464  ;;  %v765_v14 = vsel %vm757_vm11, %v744_v4, %v747_v7 }
 0x10c   : > { %v501_v18 = vsel %vm3065_vm3, %v2802_v6, %v498_v23  ;;  %v897_v34 = vclz %v2391_v27  ;;  %vm759_vm14 = vcmp.lt.s32.totalorder %v738_v13, 3  ;;  %v766_v35 = vsel %vm760_vm9, %v753_v24, 920167782 }
 0x10d   : > { %2553 = vcosq.f32 %v501_v18  ;;  %v769_v49 = vsel %vm757_vm11, %v747_v7, %v750_v51  ;;  %v761_v36 = vsel %vm757_vm11, %v741_v25, %v744_v4  ;;  %v767_v19 = vsel %vm759_vm14, %v750_v51, %v766_v35  ;;  %v3177_v25 = vld [vmem:[%s4143_s1 + $0x1] ss:$0 sm:$0xff] }
 0x10e   : > { %2555 = vsinq.f32 %v501_v18  ;;  %v2392_v26 = vadd.s32 4294967294, %v897_v34  ;;  %v770_v32 = vsel %vm760_vm9, %v756_v30, 1326507024  ;;  %v1041_v45 = vshrl.u32 %v1040_v2, 23 }
 0x10f   : > { %v763_v37 = vsel %vm759_vm14, %v747_v7, %v762_v33  ;;  %v768_v40 = vsel %vm758_vm13, %v765_v14, %v767_v19  ;;  %v771_v41 = vsel %vm759_vm14, %v753_v24, %v770_v32  ;;  %v885_v5 = vadd.s32 %v3050_v57, %v3059_v60 }
 0x110   : > { %vm2393_vm15 = vcmp.lt.s32.totalorder %v2392_v26, 0  ;;  %v772_v38 = vsel %vm758_vm13, %v769_v49, %v771_v41  ;;  %v3133_v62 = vmul.u32.u64.low %v3114_v10, %v768_v40  ;;  %v3134_v16 = vmul.u32.u64.high %v3114_v10, %v768_v40, %v3133_v62 }
 0x111   : > { %v900_v42 = vsel %vm2393_vm15, 0, %v2392_v26  ;;  %v2398_v31 = vadd.s32 4294967169, %v1041_v45  ;;  %v764_v56 = vsel %vm758_vm13, %v761_v36, %v763_v37  ;;  %v1037_v58 = vand.u32 2147483647, %v3106_v20 }
 0x112   : > { %v901_v53 = vsub.s32 32, %v900_v42  ;;  %v905_v50 = vsub.s32 4294967266, %v900_v42  ;;  %v3141_v39 = vmul.u32.u64.low %v3114_v10, %v772_v38  ;;  %v3142_v54 = vmul.u32.u64.high %v3114_v10, %v772_v38, %v3141_v39 }
 0x113   : > { %v902_v46 = vshll.u32 %v3108_v47, %v900_v42  ;;  %v1047_v55 = vadd.s32 1, %v2398_v31  ;;  %vm3148_vm0 = vcmp.le.f32.partialorder %v829_v29, 0.7853982  ;;  %v916_v60 = vsel %vm831_vm10, %v915_v28, %v3097_v43  ;;  %v3160_v47 = vld [vmem:[%s4143_s1] ss:$0 sm:$0xff] }
 0x114   : > { %v903_v8 = vshrl.u32 %v885_v5, %v901_v53  ;;  %v906_v9 = vadd.s32 127, %v905_v50  ;;  %v783_v13 = vadd.s32 1, %v3134_v16  ;;  %vm505_vm1 = vweird.f32 %v2802_v6 }
 0x115   : > { %vm1048_vm2 = vcmp.gt.s32.totalorder %v1047_v55, 0  ;;  %v273_v29 = vmul.f32 %v3160_v47, %v201_v22  ;;  %vm508_vm3 = vcmp.lt.s32.totalorder %v3099_v0, 2  ;;  %v780_v21 = vmul.u32 %v3114_v10, %v764_v56 }
 0x116   : > { %v904_v15 = vor.u32 %v903_v8, %v902_v46  ;;  %v907_v4 = vshll.u32 %v906_v9, 23  ;;  %vm782_vm4 = vc.u32 %v3142_v54, %v3133_v62  ;;  %v1049_v43 = vsel %vm1048_vm2, %v1047_v55, 0 }
 0x117   : > { %v918_v51 = vsel %vm3148_vm0, 0, %v916_v60  ;;  %v784_v11 = vsel %vm782_vm4, %v783_v13, %v3134_v16  ;;  %v1044_v17 = vand.u32 8388607, %v1037_v58  ;;  %vm509_vm5 = vcmp.eq.s32.totalorder %v3099_v0, 0 }
 0x118   : > { %v908_v7 = vor.u32 4788187, %v907_v4  ;;  %vm512_vm6 = vcmp.eq.s32.totalorder %v3099_v0, 2  ;;  %v785_v27 = vadd.s32 %v784_v11, %v780_v21  ;;  %v1051_v10 = vand.u32 31, %v1049_v43 }
 0x119   : > { %v911_v28 = vcvt.s32.f32 %v904_v15  ;;  %v3180_v30 = vadd.f32 %v3177_v25, %v273_v29  ;;  %v922_v33 = vadd.s32 3, %v918_v51  ;;  %v1045_v36 = vor.u32 8388608, %v1044_v17 }
 0x11a   : > { %v2554_v23 = vpop.eup %2553  ;;  %v909_v18 = vand.u32 2147483647, %v908_v7  ;;  %v786_v14 = vadd.s32 536870912, %v785_v27  ;;  %v1052_v26 = vsub.s32 32, %v1051_v10  ;;  %v1054_v19 = vshll.u32 %v2630_v59, %v1051_v10 }
 0x11b   : > { %v2556_v24 = vpop.eup %2555  ;;  %v513_v2 = vxor.u32 2147483648, %v2554_v23  ;;  %v1060_v40 = vshll.u32 %v2632_v63, %v1051_v10  ;;  %v1050_v50 = vshrl.u32 %v1049_v43, 5  ;;  %v936_v31 = vand.u32 2139095040, %v3180_v30 }
 0x11c   : > { %v510_v34 = vxor.u32 2147483648, %v2556_v24  ;;  %v912_v49 = vmul.f32 %v911_v28, %v909_v18  ;;  %v3185_v45 = vshrl.u32 %v786_v14, 30  ;;  %v1055_v37 = vshrl.u32 %v2631_v61, %v1052_v26 }
 0x11d   : > { %v514_v35 = vsel %vm512_vm6, %v513_v2, %v2556_v24  ;;  %v1058_v38 = vshrl.u32 %v2632_v63, %v1052_v26  ;;  %v1061_v16 = vshrl.u32 %v2633_v1, %v1052_v26  ;;  %v1057_v39 = vshll.u32 %v2631_v61, %v1051_v10 }
 0x11e   : > { %v511_v32 = vsel %vm509_vm5, %v2554_v23, %v510_v34  ;;  %v913_v42 = vxor.u32 2147483648, %v912_v49  ;;  %v788_v53 = vshll.u32 %v3185_v45, 30  ;;  %v1056_v0 = vor.u32 %v1055_v37, %v1054_v19 }
 0x11f   : > { %v515_v41 = vsel %vm508_vm3, %v511_v32, %v514_v35  ;;  %v1062_v22 = vor.u32 %v1061_v16, %v1060_v40  ;;  %v1063_v8 = vshll.u32 %v2633_v1, %v1051_v10  ;;  %v1064_v9 = vshrl.u32 %v2634_v3, %v1052_v26 }
 0x120   : > { %v516_v5 = vsel %vm505_vm1, nan, %v515_v41  ;;  %v914_v56 = vsel %vm831_vm10, %v913_v42, %v912_v49  ;;  %v3205_v6 = vsub.s32 %v785_v27, %v788_v53  ;;  %v1059_v55 = vor.u32 %v1058_v38, %v1057_v39 }
 0x121   : > { %2287 = vst.msk [vmem:[%s2967_s22 + $0x8] sm:$0xff] %vm2285_vm12, %v516_v5  ;;  %v917_v46 = vsel %vm3148_vm0, %v2916_v44, %v914_v56  ;;  %v1066_v60 = vshll.u32 %v2634_v3, %v1051_v10  ;;  %v1067_v13 = vshrl.u32 %v2635_v12, %v1052_v26  ;;  %v3211_v15 = vand.u32 3, %v922_v33 }
 0x122   : > { %2557 = vcosq.f32 %v917_v46  ;;  %v791_v4 = vsub.s32 0, %v3205_v6  ;;  %v1065_v29 = vor.u32 %v1064_v9, %v1063_v8  ;;  %vm1072_vm7 = vcmp.lt.s32.totalorder %v1050_v50, 4 }
 0x123   : > { %2559 = vsinq.f32 %v917_v46  ;;  %v1068_v57 = vor.u32 %v1067_v13, %v1066_v60  ;;  %v1085_v21 = vshll.u32 %v1045_v36, 8  ;;  %v937_v43 = vshrl.u32 %v936_v31, 23 }
 0x124   : > { %v2387_v7 = vmin.u32 %v791_v4, %v3205_v6  ;;  %v1053_v51 = vshrl.u32 %v2630_v59, %v1052_v26  ;;  %vm1069_vm8 = vcmp.lt.s32.totalorder %v1050_v50, 1  ;;  %v1074_v11 = vsel %vm1072_vm7, %v1062_v22, 2102212464 }
 0x125   : > { %v1077_v17 = vsel %vm1069_vm8, %v1056_v0, %v1059_v55  ;;  %v1078_v23 = vsel %vm1072_vm7, %v1065_v29, 920167782  ;;  %v1081_v27 = vsel %vm1069_vm8, %v1059_v55, %v1062_v22  ;;  %v1082_v10 = vsel %vm1072_vm7, %v1068_v57, 1326507024 }
 0x126   : > { %v793_v24 = vclz %v2387_v7  ;;  %vm1070_vm10 = vcmp.lt.s32.totalorder %v1050_v50, 2  ;;  %vm1071_vm11 = vcmp.lt.s32.totalorder %v1050_v50, 3  ;;  %v1073_v2 = vsel %vm1069_vm8, %v1053_v51, %v1056_v0 }
 0x127   : > { %v1075_v18 = vsel %vm1071_vm11, %v1059_v55, %v1074_v11  ;;  %v1079_v28 = vsel %vm1071_vm11, %v1062_v22, %v1078_v23  ;;  %v1083_v34 = vsel %vm1071_vm11, %v1065_v29, %v1082_v10  ;;  %v2394_v33 = vadd.s32 4294967169, %v937_v43 }
 0x128   : > { %v2388_v14 = vadd.s32 4294967294, %v793_v24  ;;  %v1080_v35 = vsel %vm1070_vm10, %v1077_v17, %v1079_v28  ;;  %v1084_v49 = vsel %vm1070_vm10, %v1081_v27, %v1083_v34  ;;  %vm727_vm9 = vcmp.lt.s32.totalorder %v3037_v52, 0 }
 0x129   : > { %v3216_v36 = vmul.u32.u64.low %v1085_v21, %v1084_v49  ;;  %v3217_v19 = vmul.u32.u64.high %v1085_v21, %v1084_v49, %v3216_v36  ;;  %v3219_v26 = vmul.u32.u64.low %v1085_v21, %v1080_v35  ;;  %v3220_v32 = vmul.u32.u64.high %v1085_v21, %v1080_v35, %v3219_v26 }
 0x12a   : > { %vm2389_vm13 = vcmp.lt.s32.totalorder %v2388_v14, 0  ;;  %v1076_v37 = vsel %vm1070_vm10, %v1073_v2, %v1075_v18  ;;  %v943_v40 = vadd.s32 1, %v2394_v33  ;;  %vm921_vm14 = vweird.f32 %v2916_v44 }
 0x12b   : > { %vm928_vm15 = vcmp.eq.s32.totalorder %v3211_v15, 2  ;;  %v796_v41 = vsel %vm2389_vm13, 0, %v2388_v14  ;;  %v811_v42 = vsub.s32 4, %v3185_v45  ;;  %v933_v38 = vand.u32 2147483647, %v3180_v30  ;;  %v211_v14 = vpop.permute.xlu0 %210 }
 0x12c   : > { %v781_v16 = vadd.s32 %v3133_v62, %v3142_v54  ;;  %v797_v5 = vsub.s32 32, %v796_v41  ;;  %v801_v53 = vsub.s32 4294967266, %v796_v41  ;;  %vm944_vm0 = vcmp.gt.s32.totalorder %v943_v40, 0 }
 0x12d   : > { %v1092_v50 = vmul.u32 %v1085_v21, %v1076_v37  ;;  %vm1094_vm1 = vc.u32 %v3217_v19, %v3219_v26  ;;  %v1095_v31 = vadd.s32 1, %v3220_v32  ;;  %v945_v56 = vsel %vm944_vm0, %v943_v40, 0  ;;  %v216_v21 = vpop.permute.xlu1 %215 }
 0x12e   : > { %v798_v39 = vshll.u32 %v3205_v6, %v796_v41  ;;  %v799_v22 = vshrl.u32 %v781_v16, %v797_v5  ;;  %v802_v46 = vadd.s32 127, %v801_v53  ;;  %v947_v8 = vand.u32 31, %v945_v56 }
 0x12f   : > { %v2558_v0 = vpop.eup %2557  ;;  %v812_v62 = vsel %vm727_vm9, %v811_v42, %v3185_v45  ;;  %v1096_v54 = vsel %vm1094_vm1, %v1095_v31, %v3220_v32  ;;  %v940_v60 = vand.u32 8388607, %v933_v38  ;;  %vm925_vm2 = vcmp.eq.s32.totalorder %v3211_v15, 0 }
 0x130   : > { %v2560_v9 = vpop.eup %2559  ;;  %v929_v55 = vxor.u32 2147483648, %v2558_v0  ;;  %v800_v4 = vor.u32 %v799_v22, %v798_v39  ;;  %v803_v29 = vshll.u32 %v802_v46, 23  ;;  %v1097_v57 = vadd.s32 %v1096_v54, %v1092_v50 }
 0x131   : > { %v926_v13 = vxor.u32 2147483648, %v2560_v9  ;;  %vm3245_vm3 = vcmp.le.f32.partialorder %v725_v48, 0.7853982  ;;  %v948_v43 = vsub.s32 32, %v947_v8  ;;  %vm924_vm4 = vcmp.lt.s32.totalorder %v3211_v15, 2 }
 0x132   : > { %v930_v6 = vsel %vm928_vm15, %v929_v55, %v2560_v9  ;;  %v804_v51 = vor.u32 4788187, %v803_v29  ;;  %v1098_v11 = vadd.s32 536870912, %v1097_v57  ;;  %v814_v23 = vsel %vm3245_vm3, 0, %v812_v62 }
 0x133   : > { %v927_v7 = vsel %vm925_vm2, %v2558_v0, %v926_v13  ;;  %v941_v27 = vor.u32 8388608, %v940_v60  ;;  %v276_v10 = vmul.f32 %v3160_v47, %v216_v21  ;;  %v807_v2 = vcvt.s32.f32 %v800_v4 }
 0x134   : > { %v931_v17 = vsel %vm924_vm4, %v927_v7, %v930_v6  ;;  %v805_v48 = vand.u32 2147483647, %v804_v51  ;;  %v3255_v18 = vshrl.u32 %v1098_v11, 30  ;;  %v946_v15 = vshrl.u32 %v945_v56, 5 }
 0x135   : > { %v932_v24 = vsel %vm921_vm14, nan, %v931_v17  ;;  %v951_v28 = vshrl.u32 %v2631_v61, %v948_v43  ;;  %v954_v34 = vshrl.u32 %v2632_v63, %v948_v43  ;;  %v957_v33 = vshrl.u32 %v2633_v1, %v948_v43 }
 0x136   : > { %2291 = vst.msk [vmem:[%s2967_s22 + $0x28] sm:$0xff] %vm2285_vm12, %v932_v24  ;;  %v808_v35 = vmul.f32 %v807_v2, %v805_v48  ;;  %v1100_v49 = vshll.u32 %v3255_v18, 30  ;;  %v956_v44 = vshll.u32 %v2632_v63, %v947_v8  ;;  %v960_v36 = vshrl.u32 %v2634_v3, %v948_v43 }
 0x137   : > { %v950_v32 = vshll.u32 %v2630_v59, %v947_v8  ;;  %v953_v37 = vshll.u32 %v2631_v61, %v947_v8  ;;  %v959_v40 = vshll.u32 %v2633_v1, %v947_v8  ;;  %v963_v41 = vshrl.u32 %v2635_v12, %v948_v43 }
 0x138   : > { %v809_v42 = vxor.u32 2147483648, %v808_v35  ;;  %v3269_v16 = vsub.s32 %v1097_v57, %v1100_v49  ;;  %v958_v5 = vor.u32 %v957_v33, %v956_v44  ;;  %v275_v53 = vmul.f32 %v3160_v47, %v211_v14 }
 0x139   : > { %v952_v50 = vor.u32 %v951_v28, %v950_v32  ;;  %v955_v31 = vor.u32 %v954_v34, %v953_v37  ;;  %v961_v56 = vor.u32 %v960_v36, %v959_v40  ;;  %v962_v0 = vshll.u32 %v2634_v3, %v947_v8 }
 0x13a   : > { %v810_v39 = vsel %vm727_vm9, %v809_v42, %v808_v35  ;;  %v818_v22 = vadd.s32 3, %v814_v23  ;;  %v1103_v46 = vsub.s32 0, %v3269_v16  ;;  %v3277_v9 = vadd.f32 %v3177_v25, %v276_v10 }
 0x13b   : > { %v813_v55 = vsel %vm3245_vm3, %v3037_v52, %v810_v39  ;;  %vm1039_vm5 = vcmp.lt.s32.totalorder %v3106_v20, 0  ;;  %v964_v62 = vor.u32 %v963_v41, %v962_v0  ;;  %vm968_vm6 = vcmp.lt.s32.totalorder %v946_v15, 4 }
 0x13c   : > { %v981_v54 = vshll.u32 %v941_v27, 8  ;;  %2561 = vcosq.f32 %v813_v55  ;;  %v2399_v8 = vmin.u32 %v1103_v46, %v3269_v16  ;;  %vm965_vm7 = vcmp.lt.s32.totalorder %v946_v15, 1 }
 0x13d   : > { %v970_v60 = vsel %vm968_vm6, %v958_v5, 2102212464  ;;  %2563 = vsinq.f32 %v813_v55  ;;  %v949_v13 = vshrl.u32 %v2630_v59, %v948_v43  ;;  %v973_v4 = vsel %vm965_vm7, %v952_v50, %v955_v31 }
 0x13e   : > { %v974_v29 = vsel %vm968_vm6, %v961_v56, 920167782  ;;  %vm3289_vm8 = vcmp.le.f32.partialorder %v1037_v58, 0.7853982  ;;  %v1105_v21 = vclz %v2399_v8  ;;  %vm966_vm10 = vcmp.lt.s32.totalorder %v946_v15, 2  ;;  %v226_v8 = vpop.permute.xlu1 %225 }
 0x13f   : > { %vm967_vm11 = vcmp.lt.s32.totalorder %v946_v15, 3  ;;  %v977_v6 = vsel %vm965_vm7, %v955_v31, %v958_v5  ;;  %v969_v45 = vsel %vm965_vm7, %v949_v13, %v952_v50  ;;  %v978_v11 = vsel %vm968_vm6, %v964_v62, 1326507024 }
 0x140   : > { %v971_v7 = vsel %vm967_vm11, %v955_v31, %v970_v60  ;;  %v975_v51 = vsel %vm967_vm11, %v958_v5, %v974_v29  ;;  %v2400_v17 = vadd.s32 4294967294, %v1105_v21  ;;  %v1123_v43 = vsub.s32 4, %v3255_v18 }
 0x141   : > { %v976_v23 = vsel %vm966_vm10, %v973_v4, %v975_v51  ;;  %v979_v27 = vsel %vm967_vm11, %v961_v56, %v978_v11  ;;  %v1248_v48 = vand.u32 2139095040, %v3277_v9  ;;  %v972_v2 = vsel %vm966_vm10, %v969_v45, %v971_v7 }
 0x142   : > { %v980_v10 = vsel %vm966_vm10, %v977_v6, %v979_v27  ;;  %v3295_v24 = vmul.u32.u64.low %v981_v54, %v976_v23  ;;  %v3296_v58 = vmul.u32.u64.high %v981_v54, %v976_v23, %v3295_v24  ;;  %vm2401_vm9 = vcmp.lt.s32.totalorder %v2400_v17, 0 }
 0x143   : > { %v3300_v28 = vmul.u32.u64.low %v981_v54, %v980_v10  ;;  %v3301_v34 = vmul.u32.u64.high %v981_v54, %v980_v10, %v3300_v28  ;;  %v819_v33 = vand.u32 3, %v818_v22  ;;  %v1108_v15 = vsel %vm2401_vm9, 0, %v2400_v17 }
 0x144   : > { %v1249_v14 = vshrl.u32 %v1248_v48, 23  ;;  %v3304_v35 = vadd.f32 %v3177_v25, %v275_v53  ;;  %v1093_v49 = vadd.s32 %v3219_v26, %v3217_v19  ;;  %v1109_v44 = vsub.s32 32, %v1108_v15 }
 0x145   : > { %v1113_v36 = vsub.s32 4294967266, %v1108_v15  ;;  %v1124_v32 = vsel %vm1039_vm5, %v1123_v43, %v3255_v18  ;;  %v988_v37 = vmul.u32 %v981_v54, %v972_v2  ;;  %v991_v40 = vadd.s32 1, %v3296_v58 }
 0x146   : > { %v1245_v41 = vand.u32 2147483647, %v3277_v9  ;;  %v2406_v42 = vadd.s32 4294967169, %v1249_v14  ;;  %v1110_v5 = vshll.u32 %v3269_v16, %v1108_v15  ;;  %v1111_v50 = vshrl.u32 %v1093_v49, %v1109_v44 }
 0x147   : > { %v1114_v53 = vadd.s32 127, %v1113_v36  ;;  %vm990_vm13 = vc.u32 %v3301_v34, %v3295_v24  ;;  %v1126_v19 = vsel %vm3289_vm8, 0, %v1124_v32  ;;  %v1144_v18 = vand.u32 2139095040, %v3304_v35 }
 0x148   : > { %v992_v26 = vsel %vm990_vm13, %v991_v40, %v3296_v58  ;;  %v1255_v31 = vadd.s32 1, %v2406_v42  ;;  %v1112_v56 = vor.u32 %v1111_v50, %v1110_v5  ;;  %vm817_vm14 = vweird.f32 %v3037_v52 }
 0x149   : > { %v1115_v0 = vshll.u32 %v1114_v53, 23  ;;  %v993_v39 = vadd.s32 %v992_v26, %v988_v37  ;;  %v2562_v22 = vpop.eup %2561  ;;  %vm821_vm15 = vcmp.eq.s32.totalorder %v819_v33, 0  ;;  %vm824_vm0 = vcmp.eq.s32.totalorder %v819_v33, 2 }
 0x14a   : > { %vm1256_vm1 = vcmp.gt.s32.totalorder %v1255_v31, 0  ;;  %v2564_v16 = vpop.eup %2563  ;;  %v825_v46 = vxor.u32 2147483648, %v2562_v22  ;;  %v1130_v62 = vadd.s32 3, %v1126_v19  ;;  %v1252_v13 = vand.u32 8388607, %v1245_v41 }
 0x14b   : > { %v1116_v55 = vor.u32 4788187, %v1115_v0  ;;  %v994_v54 = vadd.s32 536870912, %v993_v39  ;;  %v822_v60 = vxor.u32 2147483648, %v2564_v16  ;;  %v1257_v4 = vsel %vm1256_vm1, %v1255_v31, 0 }
 0x14c   : > { %v1145_v29 = vshrl.u32 %v1144_v18, 23  ;;  %v826_v21 = vsel %vm824_vm0, %v825_v46, %v2564_v16  ;;  %v1119_v45 = vcvt.s32.f32 %v1112_v56  ;;  %vm820_vm2 = vcmp.lt.s32.totalorder %v819_v33, 2 }
 0x14d   : > { %v1117_v6 = vand.u32 2147483647, %v1116_v55  ;;  %v995_v7 = vshrl.u32 %v994_v54, 30  ;;  %v823_v51 = vsel %vm821_vm15, %v2562_v22, %v822_v60  ;;  %v1259_v11 = vand.u32 31, %v1257_v4 }
 0x14e   : > { %v3325_v17 = vmul.f32 %v3160_v47, %v226_v8  ;;  %v827_v43 = vsel %vm820_vm2, %v823_v51, %v826_v21  ;;  %v3327_v27 = vand.u32 3, %v1130_v62  ;;  %vm935_vm3 = vcmp.lt.s32.totalorder %v3180_v30, 0 }
 0x14f   : > { %v1120_v23 = vmul.f32 %v1119_v45, %v1117_v6  ;;  %v996_v10 = vshll.u32 %v995_v7, 30  ;;  %v828_v58 = vsel %vm817_vm14, nan, %v827_v43  ;;  %v1253_v48 = vor.u32 8388608, %v1252_v13 }
 0x150   : > { %v1260_v2 = vsub.s32 32, %v1259_v11  ;;  %v1141_v28 = vand.u32 2147483647, %v3304_v35  ;;  %2290 = vst.msk [vmem:[%s2967_s22 + $0x20] sm:$0xff] %vm2285_vm12, %v828_v58  ;;  %v1258_v14 = vshrl.u32 %v1257_v4, 5  ;;  %v2402_v49 = vadd.s32 4294967169, %v1145_v29 }
 0x151   : > { %v1121_v33 = vxor.u32 2147483648, %v1120_v23  ;;  %v3335_v15 = vsub.s32 %v993_v39, %v996_v10  ;;  %v1262_v44 = vshll.u32 %v2630_v59, %v1259_v11  ;;  %v1265_v32 = vshll.u32 %v2631_v61, %v1259_v11 }
 0x152   : > { %v1263_v36 = vshrl.u32 %v2631_v61, %v1260_v2  ;;  %v1266_v52 = vshrl.u32 %v2632_v63, %v1260_v2  ;;  %v1268_v42 = vshll.u32 %v2632_v63, %v1259_v11  ;;  %v1269_v5 = vshrl.u32 %v2633_v1, %v1260_v2 }
 0x153   : > { %v1122_v37 = vsel %vm1039_vm5, %v1121_v33, %v1120_v23  ;;  %v999_v40 = vsub.s32 0, %v3335_v15  ;;  %v1019_v53 = vsub.s32 4, %v995_v7  ;;  %v1271_v56 = vshll.u32 %v2633_v1, %v1259_v11 }
 0x154   : > { %v1125_v50 = vsel %vm3289_vm8, %v3106_v20, %v1122_v37  ;;  %v1264_v19 = vor.u32 %v1263_v36, %v1262_v44  ;;  %v1267_v26 = vor.u32 %v1266_v52, %v1265_v32  ;;  %v1270_v18 = vor.u32 %v1269_v5, %v1268_v42 }
 0x155   : > { %2565 = vcosq.f32 %v1125_v50  ;;  %v2395_v31 = vmin.u32 %v999_v40, %v3335_v15  ;;  %v1272_v0 = vshrl.u32 %v2634_v3, %v1260_v2  ;;  %v1274_v39 = vshll.u32 %v2634_v3, %v1259_v11 }
 0x156   : > { %2567 = vsinq.f32 %v1125_v50  ;;  %v1275_v22 = vshrl.u32 %v2635_v12, %v1260_v2  ;;  %v989_v57 = vadd.s32 %v3295_v24, %v3301_v34  ;;  %v3356_v46 = vshll.u32 %v1253_v48, 8 }
 0x157   : > { %v1001_v16 = vclz %v2395_v31  ;;  %v1151_v55 = vadd.s32 1, %v2402_v49  ;;  %vm3360_vm4 = vcmp.le.f32.partialorder %v933_v38, 0.7853982  ;;  %v1020_v54 = vsel %vm935_vm3, %v1019_v53, %v995_v7 }
 0x158   : > { %v1261_v8 = vshrl.u32 %v2630_v59, %v1260_v2  ;;  %v1273_v60 = vor.u32 %v1272_v0, %v1271_v56  ;;  %v1276_v13 = vor.u32 %v1275_v22, %v1274_v39  ;;  %vm1277_vm5 = vcmp.lt.s32.totalorder %v1258_v14, 1 }
 0x159   : > { %v2396_v4 = vadd.s32 4294967294, %v1001_v16  ;;  %vm1279_vm6 = vcmp.lt.s32.totalorder %v1258_v14, 3  ;;  %vm1280_vm7 = vcmp.lt.s32.totalorder %v1258_v14, 4  ;;  %v1285_v34 = vsel %vm1277_vm5, %v1264_v19, %v1267_v26 }
 0x15a   : > { %v1282_v24 = vsel %vm1280_vm7, %v1270_v18, 2102212464  ;;  %v1286_v29 = vsel %vm1280_vm7, %v1273_v60, 920167782  ;;  %v1289_v21 = vsel %vm1277_vm5, %v1267_v26, %v1270_v18  ;;  %vm1278_vm10 = vcmp.lt.s32.totalorder %v1258_v14, 2 }
 0x15b   : > { %vm2397_vm8 = vcmp.lt.s32.totalorder %v2396_v4, 0  ;;  %v1287_v38 = vsel %vm1279_vm6, %v1270_v18, %v1286_v29  ;;  %v1290_v6 = vsel %vm1280_vm7, %v1276_v13, 1326507024  ;;  %v1281_v51 = vsel %vm1277_vm5, %v1261_v8, %v1264_v19 }
 0x15c   : > { %v1004_v45 = vsel %vm2397_vm8, 0, %v2396_v4  ;;  %v1288_v7 = vsel %vm1278_vm10, %v1285_v34, %v1287_v38  ;;  %v1291_v11 = vsel %vm1279_vm6, %v1273_v60, %v1290_v6  ;;  %v1283_v10 = vsel %vm1279_vm6, %v1267_v26, %v1282_v24 }
 0x15d   : > { %v1005_v43 = vsub.s32 32, %v1004_v45  ;;  %v1009_v23 = vsub.s32 4294967266, %v1004_v45  ;;  %v1292_v58 = vsel %vm1278_vm10, %v1289_v21, %v1291_v11  ;;  %vm1132_vm11 = vcmp.lt.s32.totalorder %v3327_v27, 2 }
 0x15e   : > { %v3374_v48 = vmul.u32.u64.low %v3356_v46, %v1292_v58  ;;  %v3375_v2 = vmul.u32.u64.high %v3356_v46, %v1292_v58, %v3374_v48  ;;  %v3378_v33 = vmul.u32.u64.low %v3356_v46, %v1288_v7  ;;  %v3379_v49 = vmul.u32.u64.high %v3356_v46, %v1288_v7, %v3378_v33 }
 0x15f   : > { %vm1129_vm9 = vweird.f32 %v3106_v20  ;;  %v1006_v44 = vshll.u32 %v3335_v15, %v1004_v45  ;;  %v1007_v36 = vshrl.u32 %v989_v57, %v1005_v43  ;;  %v1010_v32 = vadd.s32 127, %v1009_v23 }
 0x160   : > { %vm1152_vm13 = vcmp.gt.s32.totalorder %v1151_v55, 0  ;;  %vm1133_vm14 = vcmp.eq.s32.totalorder %v3327_v27, 0  ;;  %v1284_v52 = vsel %vm1278_vm10, %v1281_v51, %v1283_v10  ;;  %v1148_v37 = vand.u32 8388607, %v1141_v28 }
 0x161   : > { %v1153_v40 = vsel %vm1152_vm13, %v1151_v55, 0  ;;  %v1008_v42 = vor.u32 %v1007_v36, %v1006_v44  ;;  %v1011_v5 = vshll.u32 %v1010_v32, 23  ;;  %v1022_v50 = vsel %vm3360_vm4, 0, %v1020_v54 }
 0x162   : > { %v1155_v53 = vand.u32 31, %v1153_v40  ;;  %v2566_v19 = vpop.eup %2565  ;;  %vm1136_vm15 = vcmp.eq.s32.totalorder %v3327_v27, 2  ;;  %vm1302_vm0 = vc.u32 %v3375_v2, %v3378_v33  ;;  %v1303_v15 = vadd.s32 1, %v3379_v49 }
 0x163   : > { %v3396_v14 = vadd.f32 %v3177_v25, %v3325_v17  ;;  %v2568_v26 = vpop.eup %2567  ;;  %v1137_v31 = vxor.u32 2147483648, %v2566_v19  ;;  %v1012_v18 = vor.u32 4788187, %v1011_v5  ;;  %v1300_v56 = vmul.u32 %v3356_v46, %v1284_v52 }
 0x164   : > { %v1156_v0 = vsub.s32 32, %v1155_v53  ;;  %v1134_v39 = vxor.u32 2147483648, %v2568_v26  ;;  %v1026_v22 = vadd.s32 3, %v1022_v50  ;;  %v1304_v57 = vsel %vm1302_vm0, %v1303_v15, %v3379_v49 }
 0x165   : > { %v1149_v16 = vor.u32 8388608, %v1148_v37  ;;  %v1138_v55 = vsel %vm1136_vm15, %v1137_v31, %v2568_v26  ;;  %v1013_v54 = vand.u32 2147483647, %v1012_v18  ;;  %v1015_v8 = vcvt.s32.f32 %v1008_v42 }
 0x166   : > { %v1305_v60 = vadd.s32 %v1304_v57, %v1300_v56  ;;  %v1135_v17 = vsel %vm1133_vm14, %v2566_v19, %v1134_v39  ;;  %v1154_v13 = vshrl.u32 %v1153_v40, 5  ;;  %v1159_v4 = vshrl.u32 %v2631_v61, %v1156_v0 }
 0x167   : > { %v1162_v24 = vshrl.u32 %v2632_v63, %v1156_v0  ;;  %v1139_v46 = vsel %vm1132_vm11, %v1135_v17, %v1138_v55  ;;  %v1016_v34 = vmul.f32 %v1015_v8, %v1013_v54  ;;  %v1165_v21 = vshrl.u32 %v2633_v1, %v1156_v0 }
 0x168   : > { %v1306_v29 = vadd.s32 536870912, %v1305_v60  ;;  %v1140_v38 = vsel %vm1129_vm9, nan, %v1139_v46  ;;  %v1158_v6 = vshll.u32 %v2630_v59, %v1155_v53  ;;  %v1161_v45 = vshll.u32 %v2631_v61, %v1155_v53 }
 0x169   : > { %v1164_v51 = vshll.u32 %v2632_v63, %v1155_v53  ;;  %2293 = vst.msk [vmem:[%s2967_s22 + $0x38] sm:$0xff] %vm2285_vm12, %v1140_v38  ;;  %v1017_v7 = vxor.u32 2147483648, %v1016_v34  ;;  %v1167_v27 = vshll.u32 %v2633_v1, %v1155_v53  ;;  %v1168_v43 = vshrl.u32 %v2634_v3, %v1156_v0 }
 0x16a   : > { %v1307_v11 = vshrl.u32 %v1306_v29, 30  ;;  %v1160_v23 = vor.u32 %v1159_v4, %v1158_v6  ;;  %v1163_v10 = vor.u32 %v1162_v24, %v1161_v45  ;;  %v1170_v58 = vshll.u32 %v2634_v3, %v1155_v53 }
 0x16b   : > { %v1171_v20 = vshrl.u32 %v2635_v12, %v1156_v0  ;;  %v1018_v48 = vsel %vm935_vm3, %v1017_v7, %v1016_v34  ;;  %v1166_v44 = vor.u32 %v1165_v21, %v1164_v51  ;;  %v1169_v36 = vor.u32 %v1168_v43, %v1167_v27 }
 0x16c   : > { %v1308_v49 = vshll.u32 %v1307_v11, 30  ;;  %v1021_v32 = vsel %vm3360_vm4, %v3180_v30, %v1018_v48  ;;  %v3423_v52 = vand.u32 3, %v1026_v22  ;;  %v1189_v40 = vshll.u32 %v1149_v16, 8 }
 0x16d   : > { %v1172_v37 = vor.u32 %v1171_v20, %v1170_v58  ;;  %2569 = vcosq.f32 %v1021_v32  ;;  %vm1173_vm1 = vcmp.lt.s32.totalorder %v1154_v13, 1  ;;  %v1456_v5 = vand.u32 2139095040, %v3396_v14 }
 0x16e   : > { %v3425_v42 = vsub.s32 %v1305_v60, %v1308_v49  ;;  %2571 = vsinq.f32 %v1021_v32  ;;  %v1157_v50 = vshrl.u32 %v2630_v59, %v1156_v0  ;;  %vm1176_vm2 = vcmp.lt.s32.totalorder %v1154_v13, 4 }
 0x16f   : > { %v1181_v53 = vsel %vm1173_vm1, %v1160_v23, %v1163_v10  ;;  %vm1175_vm3 = vcmp.lt.s32.totalorder %v1154_v13, 3  ;;  %v1178_v62 = vsel %vm1176_vm2, %v1166_v44, 2102212464  ;;  %v1182_v15 = vsel %vm1176_vm2, %v1169_v36, 920167782 }
 0x170   : > { %v1311_v19 = vsub.s32 0, %v3425_v42  ;;  %vm1174_vm4 = vcmp.lt.s32.totalorder %v1154_v13, 2  ;;  %v1183_v26 = vsel %vm1175_vm3, %v1166_v44, %v1182_v15  ;;  %v1185_v31 = vsel %vm1173_vm1, %v1163_v10, %v1166_v44 }
 0x171   : > { %v1186_v18 = vsel %vm1176_vm2, %v1172_v37, 1326507024  ;;  %v1177_v39 = vsel %vm1173_vm1, %v1157_v50, %v1160_v23  ;;  %v1184_v22 = vsel %vm1174_vm4, %v1181_v53, %v1183_v26  ;;  %v1179_v16 = vsel %vm1175_vm3, %v1163_v10, %v1178_v62 }
 0x172   : > { %v2407_v56 = vmin.u32 %v1311_v19, %v3425_v42  ;;  %v1187_v57 = vsel %vm1175_vm3, %v1169_v36, %v1186_v18  ;;  %v3433_v55 = vmul.u32.u64.low %v1189_v40, %v1184_v22  ;;  %v3434_v54 = vmul.u32.u64.high %v1189_v40, %v1184_v22, %v3433_v55  ;;  %v221_v36 = vpop.permute.xlu0 %220 }
 0x173   : > { %v1188_v0 = vsel %vm1174_vm4, %v1185_v31, %v1187_v57  ;;  %v1457_v4 = vshrl.u32 %v1456_v5, 23  ;;  %vm3442_vm5 = vcmp.le.f32.partialorder %v1245_v41, 0.7853982  ;;  %v1331_v34 = vsub.s32 4, %v1307_v11  ;;  %v236_v31 = vpop.permute.xlu1 %235 }
 0x174   : > { %v1313_v8 = vclz %v2407_v56  ;;  %v3437_v60 = vmul.u32.u64.low %v1189_v40, %v1188_v0  ;;  %v3438_v17 = vmul.u32.u64.high %v1189_v40, %v1188_v0, %v3437_v60  ;;  %v1180_v29 = vsel %vm1174_vm4, %v1177_v39, %v1179_v16 }
 0x175   : > { %vm1028_vm6 = vcmp.lt.s32.totalorder %v3423_v52, 2  ;;  %vm1247_vm7 = vcmp.lt.s32.totalorder %v3277_v9, 0  ;;  %v1199_v21 = vadd.s32 1, %v3434_v54  ;;  %v2414_v38 = vadd.s32 4294967169, %v1457_v4 }
 0x176   : > { %v2408_v46 = vadd.s32 4294967294, %v1313_v8  ;;  %vm1029_vm8 = vcmp.eq.s32.totalorder %v3423_v52, 0  ;;  %v1301_v6 = vadd.s32 %v3378_v33, %v3375_v2  ;;  %v1453_v41 = vand.u32 2147483647, %v3396_v14 }
 0x177   : > { %v1196_v51 = vmul.u32 %v1189_v40, %v1180_v29  ;;  %vm1198_vm11 = vc.u32 %v3438_v17, %v3433_v55  ;;  %v1463_v13 = vadd.s32 1, %v2414_v38  ;;  %v1332_v43 = vsel %vm1247_vm7, %v1331_v34, %v1307_v11 }
 0x178   : > { %vm2409_vm10 = vcmp.lt.s32.totalorder %v2408_v46, 0  ;;  %v1200_v23 = vsel %vm1198_vm11, %v1199_v21, %v3434_v54  ;;  %vm1032_vm9 = vcmp.eq.s32.totalorder %v3423_v52, 2  ;;  %v1334_v37 = vsel %vm3442_vm5, 0, %v1332_v43 }
 0x179   : > { %v1316_v45 = vsel %vm2409_vm10, 0, %v2408_v46  ;;  %v1201_v33 = vadd.s32 %v1200_v23, %v1196_v51  ;;  %vm1464_vm13 = vcmp.gt.s32.totalorder %v1463_v13, 0  ;;  %v277_v26 = vmul.f32 %v3160_v47, %v221_v36 }
 0x17a   : > { %v1317_v7 = vsub.s32 32, %v1316_v45  ;;  %v1321_v27 = vsub.s32 4294967266, %v1316_v45  ;;  %v2570_v10 = vpop.eup %2569  ;;  %v1318_v2 = vshll.u32 %v3425_v42, %v1316_v45  ;;  %v1465_v44 = vsel %vm1464_vm13, %v1463_v13, 0 }
 0x17b   : > { %v2572_v58 = vpop.eup %2571  ;;  %v1033_v20 = vxor.u32 2147483648, %v2570_v10  ;;  %v1202_v11 = vadd.s32 536870912, %v1201_v33  ;;  %v1467_v40 = vand.u32 31, %v1465_v44  ;;  %v1460_v42 = vand.u32 8388607, %v1453_v41 }
 0x17c   : > { %v1319_v48 = vshrl.u32 %v1301_v6, %v1317_v7  ;;  %v1322_v49 = vadd.s32 127, %v1321_v27  ;;  %v1030_v32 = vxor.u32 2147483648, %v2572_v58  ;;  %vm1025_vm14 = vweird.f32 %v3180_v30 }
 0x17d   : > { %v1034_v5 = vsel %vm1032_vm9, %v1033_v20, %v2572_v58  ;;  %v3467_v62 = vshrl.u32 %v1202_v11, 30  ;;  %v1468_v15 = vsub.s32 32, %v1467_v40  ;;  %v3473_v22 = vadd.s32 3, %v1334_v37 }
 0x17e   : > { %v1320_v50 = vor.u32 %v1319_v48, %v1318_v2  ;;  %v1323_v53 = vshll.u32 %v1322_v49, 23  ;;  %v1031_v19 = vsel %vm1029_vm8, %v2570_v10, %v1030_v32  ;;  %v1461_v54 = vor.u32 8388608, %v1460_v42 }
 0x17f   : > { %v1035_v18 = vsel %vm1028_vm6, %v1031_v19, %v1034_v5  ;;  %v1204_v57 = vshll.u32 %v3467_v62, 30  ;;  %v3479_v8 = vmul.f32 %v3160_v47, %v236_v31  ;;  %v1471_v30 = vshrl.u32 %v2631_v61, %v1468_v15 }
 0x180   : > { %v1324_v56 = vor.u32 4788187, %v1323_v53  ;;  %v1036_v39 = vsel %vm1025_vm14, nan, %v1035_v18  ;;  %v1327_v0 = vcvt.s32.f32 %v1320_v50  ;;  %v1474_v52 = vshrl.u32 %v2632_v63, %v1468_v15 }
 0x181   : > { %2292 = vst.msk [vmem:[%s2967_s22 + $0x30] sm:$0xff] %vm2285_vm12, %v1036_v39  ;;  %v3481_v60 = vsub.s32 %v1201_v33, %v1204_v57  ;;  %v3486_v4 = vadd.f32 %v3177_v25, %v277_v26  ;;  %v1466_v34 = vshrl.u32 %v1465_v44, 5  ;;  %v1470_v29 = vshll.u32 %v2630_v59, %v1467_v40 }
 0x182   : > { %v1325_v16 = vand.u32 2147483647, %v1324_v56  ;;  %v1477_v21 = vshrl.u32 %v2633_v1, %v1468_v15  ;;  %v1473_v47 = vshll.u32 %v2631_v61, %v1467_v40  ;;  %v1476_v6 = vshll.u32 %v2632_v63, %v1467_v40 }
 0x183   : > { %v1207_v38 = vsub.s32 0, %v3481_v60  ;;  %v1480_v45 = vshrl.u32 %v2634_v3, %v1468_v15  ;;  %v1479_v13 = vshll.u32 %v2633_v1, %v1467_v40  ;;  %v1482_v7 = vshll.u32 %v2634_v3, %v1467_v40 }
 0x184   : > { %v1328_v46 = vmul.f32 %v1327_v0, %v1325_v16  ;;  %v1483_v27 = vshrl.u32 %v2635_v12, %v1468_v15  ;;  %v1197_v43 = vadd.s32 %v3433_v55, %v3438_v17  ;;  %v1472_v10 = vor.u32 %v1471_v30, %v1470_v29 }
 0x185   : > { %v2403_v23 = vmin.u32 %v1207_v38, %v3481_v60  ;;  %v1475_v2 = vor.u32 %v1474_v52, %v1473_v47  ;;  %v1478_v58 = vor.u32 %v1477_v21, %v1476_v6  ;;  %v1481_v20 = vor.u32 %v1480_v45, %v1479_v13 }
 0x186   : > { %v1329_v51 = vxor.u32 2147483648, %v1328_v46  ;;  %v1484_v48 = vor.u32 %v1483_v27, %v1482_v7  ;;  %vm1143_vm15 = vcmp.lt.s32.totalorder %v3304_v35, 0  ;;  %v1227_v36 = vsub.s32 4, %v3467_v62 }
 0x187   : > { %v1209_v44 = vclz %v2403_v23  ;;  %v1501_v55 = vshll.u32 %v1461_v54, 8  ;;  %v1469_v17 = vshrl.u32 %v2630_v59, %v1468_v15  ;;  %vm1485_vm0 = vcmp.lt.s32.totalorder %v1466_v34, 1 }
 0x188   : > { %v1330_v33 = vsel %vm1247_vm7, %v1329_v51, %v1328_v46  ;;  %vm1487_vm1 = vcmp.lt.s32.totalorder %v1466_v34, 3  ;;  %vm1488_vm2 = vcmp.lt.s32.totalorder %v1466_v34, 4  ;;  %v1493_v37 = vsel %vm1485_vm0, %v1472_v10, %v1475_v2 }
 0x189   : > { %v1333_v49 = vsel %vm3442_vm5, %v3277_v9, %v1330_v33  ;;  %v2404_v32 = vadd.s32 4294967294, %v1209_v44  ;;  %v1490_v11 = vsel %vm1488_vm2, %v1478_v58, 2102212464  ;;  %v1494_v40 = vsel %vm1488_vm2, %v1481_v20, 920167782 }
 0x18a   : > { %2573 = vcosq.f32 %v1333_v49  ;;  %v1497_v5 = vsel %vm1485_vm0, %v1475_v2, %v1478_v58  ;;  %v1498_v24 = vsel %vm1488_vm2, %v1484_v48, 1326507024  ;;  %vm1486_vm4 = vcmp.lt.s32.totalorder %v1466_v34, 2 }
 0x18b   : > { %2575 = vsinq.f32 %v1333_v49  ;;  %vm2405_vm3 = vcmp.lt.s32.totalorder %v2404_v32, 0  ;;  %v1495_v50 = vsel %vm1487_vm1, %v1478_v58, %v1494_v40  ;;  %v1499_v53 = vsel %vm1487_vm1, %v1481_v20, %v1498_v24 }
 0x18c   : > { %v1212_v42 = vsel %vm2405_vm3, 0, %v2404_v32  ;;  %v1489_v19 = vsel %vm1485_vm0, %v1469_v17, %v1472_v10  ;;  %v1496_v15 = vsel %vm1486_vm4, %v1493_v37, %v1495_v50  ;;  %v1500_v26 = vsel %vm1486_vm4, %v1497_v5, %v1499_v53 }
 0x18d   : > { %v1213_v31 = vsub.s32 32, %v1212_v42  ;;  %v1217_v18 = vsub.s32 4294967266, %v1212_v42  ;;  %v1491_v56 = vsel %vm1487_vm1, %v1475_v2, %v1490_v11  ;;  %v1352_v39 = vand.u32 2139095040, %v3486_v4 }
 0x18e   : > { %v3514_v57 = vmul.u32.u64.low %v1501_v55, %v1500_v26  ;;  %v3515_v16 = vmul.u32.u64.high %v1501_v55, %v1500_v26, %v3514_v57  ;;  %v3517_v0 = vmul.u32.u64.low %v1501_v55, %v1496_v15  ;;  %v3518_v54 = vmul.u32.u64.high %v1501_v55, %v1496_v15, %v3517_v0 }
 0x18f   : > { %v1214_v30 = vshll.u32 %v3481_v60, %v1212_v42  ;;  %v1215_v52 = vshrl.u32 %v1197_v43, %v1213_v31  ;;  %v1218_v46 = vadd.s32 127, %v1217_v18  ;;  %v1353_v29 = vshrl.u32 %v1352_v39, 23 }
 0x190   : > { %v1228_v21 = vsel %vm1143_vm15, %v1227_v36, %v3467_v62  ;;  %v1492_v38 = vsel %vm1486_vm4, %v1489_v19, %v1491_v56  ;;  %v3528_v47 = vadd.f32 %v3177_v25, %v3479_v8  ;;  %vm3532_vm5 = vcmp.le.f32.partialorder %v1141_v28, 0.7853982 }
 0x191   : > { %v1216_v60 = vor.u32 %v1215_v52, %v1214_v30  ;;  %v1219_v45 = vshll.u32 %v1218_v46, 23  ;;  %v2410_v51 = vadd.s32 4294967169, %v1353_v29  ;;  %v1339_v13 = vand.u32 3, %v3473_v22 }
 0x192   : > { %vm1510_vm6 = vc.u32 %v3515_v16, %v3517_v0  ;;  %v1511_v62 = vadd.s32 1, %v3518_v54  ;;  %v1349_v34 = vand.u32 2147483647, %v3486_v4  ;;  %v1230_v8 = vsel %vm3532_vm5, 0, %v1228_v21 }
 0x193   : > { %v1220_v25 = vor.u32 4788187, %v1219_v45  ;;  %v1508_v28 = vmul.u32 %v1501_v55, %v1492_v38  ;;  %v1359_v7 = vadd.s32 1, %v2410_v51  ;;  %v1664_v43 = vand.u32 2139095040, %v3528_v47 }
 0x194   : > { %v1512_v27 = vsel %vm1510_vm6, %v1511_v62, %v3518_v54  ;;  %v1223_v22 = vcvt.s32.f32 %v1216_v60  ;;  %vm1344_vm8 = vcmp.eq.s32.totalorder %v1339_v13, 2  ;;  %v1234_v20 = vadd.s32 3, %v1230_v8 }
 0x195   : > { %v1221_v10 = vand.u32 2147483647, %v1220_v25  ;;  %v1513_v2 = vadd.s32 %v1512_v27, %v1508_v28  ;;  %vm1360_vm7 = vcmp.gt.s32.totalorder %v1359_v7, 0  ;;  %v1356_v55 = vand.u32 8388607, %v1349_v34 }
 0x196   : > { %v1361_v48 = vsel %vm1360_vm7, %v1359_v7, 0  ;;  %vm1341_vm10 = vcmp.eq.s32.totalorder %v1339_v13, 0  ;;  %v1665_v37 = vshrl.u32 %v1664_v43, 23  ;;  %vm1340_vm11 = vcmp.lt.s32.totalorder %v1339_v13, 2 }
 0x197   : > { %v2574_v23 = vpop.eup %2573  ;;  %v1224_v44 = vmul.f32 %v1223_v22, %v1221_v10  ;;  %v1514_v36 = vadd.s32 536870912, %v1513_v2  ;;  %v1363_v32 = vand.u32 31, %v1361_v48  ;;  %vm1337_vm9 = vweird.f32 %v3277_v9 }
 0x198   : > { %v2576_v33 = vpop.eup %2575  ;;  %v1345_v58 = vxor.u32 2147483648, %v2574_v23  ;;  %v3550_v50 = vand.u32 3, %v1234_v20  ;;  %v1357_v26 = vor.u32 8388608, %v1356_v55  ;;  %v2422_v56 = vadd.s32 4294967169, %v1665_v37 }
 0x199   : > { %v1342_v49 = vxor.u32 2147483648, %v2576_v33  ;;  %v1225_v40 = vxor.u32 2147483648, %v1224_v44  ;;  %v3547_v5 = vshrl.u32 %v1514_v36, 30  ;;  %v1364_v53 = vsub.s32 32, %v1363_v32 }
 0x19a   : > { %v1346_v17 = vsel %vm1344_vm8, %v1345_v58, %v2576_v33  ;;  %v1366_v57 = vshll.u32 %v2630_v59, %v1363_v32  ;;  %v1369_v54 = vshll.u32 %v2631_v61, %v1363_v32  ;;  %v1362_v30 = vshrl.u32 %v1361_v48, 5 }
 0x19b   : > { %v1343_v11 = vsel %vm1341_vm10, %v2574_v23, %v1342_v49  ;;  %v1226_v19 = vsel %vm1143_vm15, %v1225_v40, %v1224_v44  ;;  %v1516_v15 = vshll.u32 %v3547_v5, 30  ;;  %v1367_v18 = vshrl.u32 %v2631_v61, %v1364_v53 }
 0x19c   : > { %v1347_v24 = vsel %vm1340_vm11, %v1343_v11, %v1346_v17  ;;  %v1229_v31 = vsel %vm3532_vm5, %v3304_v35, %v1226_v19  ;;  %v1370_v9 = vshrl.u32 %v2632_v63, %v1364_v53  ;;  %v1372_v52 = vshll.u32 %v2632_v63, %v1363_v32 }
 0x19d   : > { %v1348_v42 = vsel %vm1337_vm9, nan, %v1347_v24  ;;  %2577 = vcosq.f32 %v1229_v31  ;;  %v3562_v39 = vsub.s32 %v1513_v2, %v1516_v15  ;;  %v1661_v46 = vand.u32 2147483647, %v3528_v47 }
 0x19e   : > { %2295 = vst.msk [vmem:[%s2967_s22 + $0x48] sm:$0xff] %vm2285_vm12, %v1348_v42  ;;  %2579 = vsinq.f32 %v1229_v31  ;;  %v1368_v21 = vor.u32 %v1367_v18, %v1366_v57  ;;  %v1371_v38 = vor.u32 %v1370_v9, %v1369_v54  ;;  %v1373_v6 = vshrl.u32 %v2633_v1, %v1364_v53 }
 0x19f   : > { %v1519_v29 = vsub.s32 0, %v3562_v39  ;;  %v1375_v60 = vshll.u32 %v2633_v1, %v1363_v32  ;;  %v1376_v45 = vshrl.u32 %v2634_v3, %v1364_v53  ;;  %v1378_v51 = vshll.u32 %v2634_v3, %v1363_v32 }
 0x1a0   : > { %v1379_v13 = vshrl.u32 %v2635_v12, %v1364_v53  ;;  %v1374_v25 = vor.u32 %v1373_v6, %v1372_v52  ;;  %v1397_v8 = vshll.u32 %v1357_v26, 8  ;;  %v1671_v28 = vadd.s32 1, %v2422_v56 }
 0x1a1   : > { %v2415_v62 = vmin.u32 %v1519_v29, %v3562_v39  ;;  %v1365_v7 = vshrl.u32 %v2630_v59, %v1364_v53  ;;  %v1377_v27 = vor.u32 %v1376_v45, %v1375_v60  ;;  %vm1381_vm13 = vcmp.lt.s32.totalorder %v1362_v30, 1 }
 0x1a2   : > { %v1380_v43 = vor.u32 %v1379_v13, %v1378_v51  ;;  %vm1382_vm14 = vcmp.lt.s32.totalorder %v1362_v30, 2  ;;  %vm1383_vm15 = vcmp.lt.s32.totalorder %v1362_v30, 3  ;;  %vm1384_vm0 = vcmp.lt.s32.totalorder %v1362_v30, 4 }
 0x1a3   : > { %v1521_v23 = vclz %v2415_v62  ;;  %vm1240_vm1 = vcmp.eq.s32.totalorder %v3550_v50, 2  ;;  %v1386_v10 = vsel %vm1384_vm0, %v1374_v25, 2102212464  ;;  %v1389_v22 = vsel %vm1381_vm13, %v1368_v21, %v1371_v38 }
 0x1a4   : > { %v1390_v2 = vsel %vm1384_vm0, %v1377_v27, 920167782  ;;  %v1393_v33 = vsel %vm1381_vm13, %v1371_v38, %v1374_v25  ;;  %vm1237_vm2 = vcmp.eq.s32.totalorder %v3550_v50, 0  ;;  %v1385_v20 = vsel %vm1381_vm13, %v1365_v7, %v1368_v21  ;;  %v231_v21 = vpop.permute.xlu0 %230 }
 0x1a5   : > { %v2416_v58 = vadd.s32 4294967294, %v1521_v23  ;;  %v1391_v48 = vsel %vm1383_vm15, %v1374_v25, %v1390_v2  ;;  %v1394_v49 = vsel %vm1384_vm0, %v1380_v43, 1326507024  ;;  %vm1455_vm3 = vcmp.lt.s32.totalorder %v3396_v14, 0  ;;  %v3608_v25 = vld [vmem:[%s4143_s1] ss:$0 sm:$0xff] }
 0x1a6   : > { %v1387_v44 = vsel %vm1383_vm15, %v1371_v38, %v1386_v10  ;;  %v1392_v36 = vsel %vm1382_vm14, %v1389_v22, %v1391_v48  ;;  %v1395_v55 = vsel %vm1383_vm15, %v1377_v27, %v1394_v49  ;;  %vm1672_vm4 = vcmp.gt.s32.totalorder %v1671_v28, 0 }
 0x1a7   : > { %vm1233_vm5 = vweird.f32 %v3304_v35  ;;  %vm2417_vm6 = vcmp.lt.s32.totalorder %v2416_v58, 0  ;;  %v1396_v17 = vsel %vm1382_vm14, %v1393_v33, %v1395_v55  ;;  %v1509_v11 = vadd.s32 %v3517_v0, %v3515_v16 }
 0x1a8   : > { %v3582_v32 = vmul.u32.u64.low %v1397_v8, %v1392_v36  ;;  %v3583_v37 = vmul.u32.u64.high %v1397_v8, %v1392_v36, %v3582_v32  ;;  %v1524_v40 = vsel %vm2417_vm6, 0, %v2416_v58  ;;  %v1388_v15 = vsel %vm1382_vm14, %v1385_v20, %v1387_v44 }
 0x1a9   : > { %v3588_v24 = vmul.u32.u64.low %v1397_v8, %v1396_v17  ;;  %v3589_v53 = vmul.u32.u64.high %v1397_v8, %v1396_v17, %v3588_v24  ;;  %v1525_v42 = vsub.s32 32, %v1524_v40  ;;  %v1529_v19 = vsub.s32 4294967266, %v1524_v40 }
 0x1aa   : > { %v1673_v26 = vsel %vm1672_vm4, %v1671_v28, 0  ;;  %v2578_v31 = vpop.eup %2577  ;;  %v1526_v18 = vshll.u32 %v3562_v39, %v1524_v40  ;;  %v1539_v9 = vsub.s32 4, %v3547_v5  ;;  %v1668_v56 = vand.u32 8388607, %v1661_v46 }
 0x1ab   : > { %v1675_v57 = vand.u32 31, %v1673_v26  ;;  %v2580_v54 = vpop.eup %2579  ;;  %v1241_v16 = vxor.u32 2147483648, %v2578_v31  ;;  %v1527_v0 = vshrl.u32 %v1509_v11, %v1525_v42  ;;  %v1530_v52 = vadd.s32 127, %v1529_v19 }
 0x1ac   : > { %v1407_v29 = vadd.s32 1, %v3583_v37  ;;  %v1238_v38 = vxor.u32 2147483648, %v2580_v54  ;;  %v1404_v30 = vmul.u32 %v1397_v8, %v1388_v15  ;;  %vm1406_vm7 = vc.u32 %v3589_v53, %v3582_v32 }
 0x1ad   : > { %v1676_v6 = vsub.s32 32, %v1675_v57  ;;  %v1242_v39 = vsel %vm1240_vm1, %v1241_v16, %v2580_v54  ;;  %v1528_v60 = vor.u32 %v1527_v0, %v1526_v18  ;;  %v1531_v45 = vshll.u32 %v1530_v52, 23 }
 0x1ae   : > { %v1408_v51 = vsel %vm1406_vm7, %v1407_v29, %v3583_v37  ;;  %vm1236_vm8 = vcmp.lt.s32.totalorder %v3550_v50, 2  ;;  %v1239_v13 = vsel %vm1237_vm2, %v2578_v31, %v1238_v38  ;;  %v279_v8 = vmul.f32 %v3608_v25, %v231_v21 }
 0x1af   : > { %v1409_v62 = vadd.s32 %v1408_v51, %v1404_v30  ;;  %v1243_v28 = vsel %vm1236_vm8, %v1239_v13, %v1242_v39  ;;  %v1532_v7 = vor.u32 4788187, %v1531_v45  ;;  %v1540_v27 = vsel %vm1455_vm3, %v1539_v9, %v3547_v5 }
 0x1b0   : > { %v1669_v43 = vor.u32 8388608, %v1668_v56  ;;  %v1244_v23 = vsel %vm1233_vm5, nan, %v1243_v28  ;;  %v1679_v10 = vshrl.u32 %v2631_v61, %v1676_v6  ;;  %v1682_v22 = vshrl.u32 %v2632_v63, %v1676_v6 }
 0x1b1   : > { %v1410_v50 = vadd.s32 536870912, %v1409_v62  ;;  %2294 = vst.msk [vmem:[%s2967_s22 + $0x40] sm:$0xff] %vm2285_vm12, %v1244_v23  ;;  %v1533_v2 = vand.u32 2147483647, %v1532_v7  ;;  %v1535_v33 = vcvt.s32.f32 %v1528_v60  ;;  %v1674_v58 = vshrl.u32 %v1673_v26, 5 }
 0x1b2   : > { %v1685_v20 = vshrl.u32 %v2633_v1, %v1676_v6  ;;  %v1678_v49 = vshll.u32 %v2630_v59, %v1675_v57  ;;  %v1681_v5 = vshll.u32 %v2631_v61, %v1675_v57  ;;  %v1688_v35 = vshrl.u32 %v2634_v3, %v1676_v6 }
 0x1b3   : > { %v1411_v48 = vshrl.u32 %v1410_v50, 30  ;;  %v1536_v44 = vmul.f32 %v1535_v33, %v1533_v2  ;;  %v1684_v36 = vshll.u32 %v2632_v63, %v1675_v57  ;;  %v1687_v55 = vshll.u32 %v2633_v1, %v1675_v57 }
 0x1b4   : > { %v1691_v17 = vshrl.u32 %v2635_v12, %v1676_v6  ;;  %vm3629_vm10 = vcmp.le.f32.partialorder %v1453_v41, 0.7853982  ;;  %v1680_v40 = vor.u32 %v1679_v10, %v1678_v49  ;;  %v1683_v24 = vor.u32 %v1682_v22, %v1681_v5  ;;  %v3641_v41 = vld [vmem:[%s4143_s1 + $0x1] ss:$0 sm:$0xff] }
 0x1b5   : > { %v1412_v11 = vshll.u32 %v1411_v48, 30  ;;  %v1537_v42 = vxor.u32 2147483648, %v1536_v44  ;;  %v1686_v19 = vor.u32 %v1685_v20, %v1684_v36  ;;  %v1689_v15 = vor.u32 %v1688_v35, %v1687_v55 }
 0x1b6   : > { %v1690_v26 = vshll.u32 %v2634_v3, %v1675_v57  ;;  %v1542_v31 = vsel %vm3629_vm10, 0, %v1540_v27  ;;  %v1709_v9 = vshll.u32 %v1669_v43, 8  ;;  %v3644_v56 = vadd.f32 %v3641_v41, %v279_v8 }
 0x1b7   : > { %v3636_v18 = vsub.s32 %v1409_v62, %v1412_v11  ;;  %v1538_v54 = vsel %vm1455_vm3, %v1537_v42, %v1536_v44  ;;  %v1677_v16 = vshrl.u32 %v2630_v59, %v1676_v6  ;;  %vm1693_vm11 = vcmp.lt.s32.totalorder %v1674_v58, 1 }
 0x1b8   : > { %v1692_v57 = vor.u32 %v1691_v17, %v1690_v26  ;;  %v1541_v0 = vsel %vm3629_vm10, %v3396_v14, %v1538_v54  ;;  %vm1696_vm9 = vcmp.lt.s32.totalorder %v1674_v58, 4  ;;  %v1701_v29 = vsel %vm1693_vm11, %v1680_v40, %v1683_v24 }
 0x1b9   : > { %v1415_v52 = vsub.s32 0, %v3636_v18  ;;  %2581 = vcosq.f32 %v1541_v0  ;;  %vm1695_vm13 = vcmp.lt.s32.totalorder %v1674_v58, 3  ;;  %v1698_v21 = vsel %vm1696_vm9, %v1686_v19, 2102212464 }
 0x1ba   : > { %v1702_v38 = vsel %vm1696_vm9, %v1689_v15, 920167782  ;;  %2583 = vsinq.f32 %v1541_v0  ;;  %vm1694_vm14 = vcmp.lt.s32.totalorder %v1674_v58, 2  ;;  %v1435_v39 = vsub.s32 4, %v1411_v48 }
 0x1bb   : > { %v2411_v30 = vmin.u32 %v1415_v52, %v3636_v18  ;;  %v1703_v6 = vsel %vm1695_vm13, %v1686_v19, %v1702_v38  ;;  %v1705_v45 = vsel %vm1693_vm11, %v1683_v24, %v1686_v19  ;;  %v1706_v51 = vsel %vm1696_vm9, %v1692_v57, 1326507024 }
 0x1bc   : > { %v1704_v60 = vsel %vm1694_vm14, %v1701_v29, %v1703_v6  ;;  %v1546_v13 = vadd.s32 3, %v1542_v31  ;;  %v1697_v8 = vsel %vm1693_vm11, %v1677_v16, %v1680_v40  ;;  %v1699_v28 = vsel %vm1695_vm13, %v1683_v24, %v1698_v21 }
 0x1bd   : > { %v1417_v62 = vclz %v2411_v30  ;;  %v1707_v7 = vsel %vm1695_vm13, %v1689_v15, %v1706_v51  ;;  %v3658_v27 = vmul.u32.u64.low %v1709_v9, %v1704_v60  ;;  %v3659_v43 = vmul.u32.u64.high %v1709_v9, %v1704_v60, %v3658_v27 }
 0x1be   : > { %v1560_v23 = vand.u32 2139095040, %v3644_v56  ;;  %vm1351_vm15 = vcmp.lt.s32.totalorder %v3486_v4, 0  ;;  %v1708_v10 = vsel %vm1694_vm14, %v1705_v45, %v1707_v7  ;;  %v1557_v22 = vand.u32 2147483647, %v3644_v56 }
 0x1bf   : > { %v2412_v50 = vadd.s32 4294967294, %v1417_v62  ;;  %v1436_v2 = vsel %vm1351_vm15, %v1435_v39, %v1411_v48  ;;  %v3668_v33 = vmul.u32.u64.low %v1709_v9, %v1708_v10  ;;  %v3669_v20 = vmul.u32.u64.high %v1709_v9, %v1708_v10, %v3668_v33 }
 0x1c0   : > { %v1561_v49 = vshrl.u32 %v1560_v23, 23  ;;  %vm3673_vm0 = vcmp.le.f32.partialorder %v1349_v34, 0.7853982  ;;  %v1700_v35 = vsel %vm1694_vm14, %v1697_v8, %v1699_v28  ;;  %v1547_v44 = vand.u32 3, %v1546_v13  ;;  %v246_v34 = vpop.permute.xlu1 %245 }
 0x1c1   : > { %vm2413_vm1 = vcmp.lt.s32.totalorder %v2412_v50, 0  ;;  %v1719_v55 = vadd.s32 1, %v3659_v43  ;;  %v1405_v48 = vadd.s32 %v3582_v32, %v3589_v53  ;;  %v1438_v40 = vsel %vm3673_vm0, 0, %v1436_v2 }
 0x1c2   : > { %v1420_v36 = vsel %vm2413_vm1, 0, %v2412_v50  ;;  %v2418_v17 = vadd.s32 4294967169, %v1561_v49  ;;  %v1716_v24 = vmul.u32 %v1709_v9, %v1700_v35  ;;  %vm1718_vm2 = vc.u32 %v3669_v20, %v3658_v27 }
 0x1c3   : > { %v1421_v37 = vsub.s32 32, %v1420_v36  ;;  %v1425_v11 = vsub.s32 4294967266, %v1420_v36  ;;  %v1564_v58 = vand.u32 8388607, %v1557_v22  ;;  %v1422_v19 = vshll.u32 %v3636_v18, %v1420_v36 }
 0x1c4   : > { %v1567_v42 = vadd.s32 1, %v2418_v17  ;;  %v1720_v32 = vsel %vm1718_vm2, %v1719_v55, %v3659_v43  ;;  %vm1545_vm3 = vweird.f32 %v3396_v14  ;;  %v282_v31 = vmul.f32 %v3608_v25, %v246_v34 }
 0x1c5   : > { %v1423_v15 = vshrl.u32 %v1405_v48, %v1421_v37  ;;  %v1426_v26 = vadd.s32 127, %v1425_v11  ;;  %v1721_v53 = vadd.s32 %v1720_v32, %v1716_v24  ;;  %v1442_v57 = vadd.s32 3, %v1438_v40 }
 0x1c6   : > { %vm1568_vm4 = vcmp.gt.s32.totalorder %v1567_v42, 0  ;;  %v2582_v9 = vpop.eup %2581  ;;  %v1565_v38 = vor.u32 8388608, %v1564_v58  ;;  %vm1549_vm5 = vcmp.eq.s32.totalorder %v1547_v44, 0  ;;  %vm1552_vm6 = vcmp.eq.s32.totalorder %v1547_v44, 2 }
 0x1c7   : > { %v1424_v54 = vor.u32 %v1423_v15, %v1422_v19  ;;  %v1427_v16 = vshll.u32 %v1426_v26, 23  ;;  %v1569_v0 = vsel %vm1568_vm4, %v1567_v42, 0  ;;  %v2584_v52 = vpop.eup %2583  ;;  %v1553_v29 = vxor.u32 2147483648, %v2582_v9 }
 0x1c8   : > { %v1722_v21 = vadd.s32 536870912, %v1721_v53  ;;  %v1571_v18 = vand.u32 31, %v1569_v0  ;;  %v1550_v30 = vxor.u32 2147483648, %v2584_v52  ;;  %v3694_v51 = vadd.f32 %v3641_v41, %v282_v31 }
 0x1c9   : > { %v1428_v6 = vor.u32 4788187, %v1427_v16  ;;  %v1554_v39 = vsel %vm1552_vm6, %v1553_v29, %v2584_v52  ;;  %vm1548_vm7 = vcmp.lt.s32.totalorder %v1547_v44, 2  ;;  %v1431_v8 = vcvt.s32.f32 %v1424_v54 }
 0x1ca   : > { %v3691_v60 = vshrl.u32 %v1722_v21, 30  ;;  %v1572_v45 = vsub.s32 32, %v1571_v18  ;;  %v1551_v13 = vsel %vm1549_vm5, %v2582_v9, %v1550_v30  ;;  %v3696_v7 = vand.u32 3, %v1442_v57 }
 0x1cb   : > { %v1429_v62 = vand.u32 2147483647, %v1428_v6  ;;  %v1555_v28 = vsel %vm1548_vm7, %v1551_v13, %v1554_v39  ;;  %v3699_v23 = vshll.u32 %v1565_v38, 8  ;;  %v1574_v35 = vshll.u32 %v2630_v59, %v1571_v18 }
 0x1cc   : > { %v1724_v43 = vshll.u32 %v3691_v60, 30  ;;  %v1556_v50 = vsel %vm1545_vm3, nan, %v1555_v28  ;;  %v1575_v2 = vshrl.u32 %v2631_v61, %v1572_v45  ;;  %v1578_v33 = vshrl.u32 %v2632_v63, %v1572_v45 }
 0x1cd   : > { %v1432_v10 = vmul.f32 %v1431_v8, %v1429_v62  ;;  %2297 = vst.msk [vmem:[%s2967_s22 + $0x58] sm:$0xff] %vm2285_vm12, %v1556_v50  ;;  %v1581_v44 = vshrl.u32 %v2633_v1, %v1572_v45  ;;  %v1872_v36 = vand.u32 2139095040, %v3694_v51  ;;  %v1570_v17 = vshrl.u32 %v1569_v0, 5 }
 0x1ce   : > { %v3707_v49 = vsub.s32 %v1721_v53, %v1724_v43  ;;  %v1577_v14 = vshll.u32 %v2631_v61, %v1571_v18  ;;  %v1580_v48 = vshll.u32 %v2632_v63, %v1571_v18  ;;  %v1576_v11 = vor.u32 %v1575_v2, %v1574_v35 }
 0x1cf   : > { %v1433_v55 = vxor.u32 2147483648, %v1432_v10  ;;  %v1583_v40 = vshll.u32 %v2633_v1, %v1571_v18  ;;  %v1584_v34 = vshrl.u32 %v2634_v3, %v1572_v45  ;;  %v1586_v42 = vshll.u32 %v2634_v3, %v1571_v18 }
 0x1d0   : > { %v1727_v37 = vsub.s32 0, %v3707_v49  ;;  %v1579_v58 = vor.u32 %v1578_v33, %v1577_v14  ;;  %v1587_v19 = vshrl.u32 %v2635_v12, %v1572_v45  ;;  %v1582_v32 = vor.u32 %v1581_v44, %v1580_v48 }
 0x1d1   : > { %v1434_v24 = vsel %vm1351_vm15, %v1433_v55, %v1432_v10  ;;  %v1585_v53 = vor.u32 %v1584_v34, %v1583_v40  ;;  %v1747_v31 = vsub.s32 4, %v3691_v60  ;;  %v1873_v54 = vshrl.u32 %v1872_v36, 23 }
 0x1d2   : > { %v1437_v15 = vsel %vm3673_vm0, %v3486_v4, %v1434_v24  ;;  %v2423_v26 = vmin.u32 %v1727_v37, %v3707_v49  ;;  %v1588_v9 = vor.u32 %v1587_v19, %v1586_v42  ;;  %v1573_v57 = vshrl.u32 %v2630_v59, %v1572_v45  ;;  %v241_v37 = vpop.permute.xlu0 %240  ;;  %v256_v24 = vpop.permute.xlu1 %255 }
 0x1d3   : > { %2585 = vcosq.f32 %v1437_v15  ;;  %vm1589_vm8 = vcmp.lt.s32.totalorder %v1570_v17, 1  ;;  %vm1590_vm10 = vcmp.lt.s32.totalorder %v1570_v17, 2  ;;  %vm1591_vm11 = vcmp.lt.s32.totalorder %v1570_v17, 3 }
 0x1d4   : > { %2587 = vsinq.f32 %v1437_v15  ;;  %v1729_v16 = vclz %v2423_v26  ;;  %vm1592_vm9 = vcmp.lt.s32.totalorder %v1570_v17, 4  ;;  %v1597_v0 = vsel %vm1589_vm8, %v1576_v11, %v1579_v58 }
 0x1d5   : > { %v1594_v52 = vsel %vm1592_vm9, %v1582_v32, 2102212464  ;;  %v1598_v29 = vsel %vm1592_vm9, %v1585_v53, 920167782  ;;  %v1601_v21 = vsel %vm1589_vm8, %v1579_v58, %v1582_v32  ;;  %v1593_v38 = vsel %vm1589_vm8, %v1573_v57, %v1576_v11 }
 0x1d6   : > { %v2424_v5 = vadd.s32 4294967294, %v1729_v16  ;;  %v1599_v18 = vsel %vm1591_vm11, %v1582_v32, %v1598_v29  ;;  %v1602_v30 = vsel %vm1592_vm9, %v1588_v9, 1326507024  ;;  %v2430_v6 = vadd.s32 4294967169, %v1873_v54 }
 0x1d7   : > { %v1595_v39 = vsel %vm1591_vm11, %v1579_v58, %v1594_v52  ;;  %v1600_v13 = vsel %vm1590_vm10, %v1597_v0, %v1599_v18  ;;  %v1603_v62 = vsel %vm1591_vm11, %v1585_v53, %v1602_v30  ;;  %vm1663_vm14 = vcmp.lt.s32.totalorder %v3528_v47, 0 }
 0x1d8   : > { %vm2425_vm13 = vcmp.lt.s32.totalorder %v2424_v5, 0  ;;  %v1604_v45 = vsel %vm1590_vm10, %v1601_v21, %v1603_v62  ;;  %v3730_v28 = vmul.u32.u64.low %v3699_v23, %v1600_v13  ;;  %v3731_v43 = vmul.u32.u64.high %v3699_v23, %v1600_v13, %v3730_v28 }
 0x1d9   : > { %v1732_v8 = vsel %vm2425_vm13, 0, %v2424_v5  ;;  %v1717_v50 = vadd.s32 %v3658_v27, %v3669_v20  ;;  %vm3739_vm15 = vcmp.le.f32.partialorder %v1661_v46, 0.7853982  ;;  %v1879_v36 = vadd.s32 1, %v2430_v6 }
 0x1da   : > { %v1733_v10 = vsub.s32 32, %v1732_v8  ;;  %v1737_v2 = vsub.s32 4294967266, %v1732_v8  ;;  %v3744_v35 = vmul.u32.u64.low %v3699_v23, %v1604_v45  ;;  %v3745_v44 = vmul.u32.u64.high %v3699_v23, %v1604_v45, %v3744_v35 }
 0x1db   : > { %vm1444_vm0 = vcmp.lt.s32.totalorder %v3696_v7, 2  ;;  %v1734_v55 = vshll.u32 %v3707_v49, %v1732_v8  ;;  %v1596_v27 = vsel %vm1590_vm10, %v1593_v38, %v1595_v39  ;;  %vm1441_vm1 = vweird.f32 %v3486_v4 }
 0x1dc   : > { %v1735_v14 = vshrl.u32 %v1717_v50, %v1733_v10  ;;  %v1738_v48 = vadd.s32 127, %v1737_v2  ;;  %vm1445_vm2 = vcmp.eq.s32.totalorder %v3696_v7, 0  ;;  %v1748_v46 = vsel %vm1663_vm14, %v1747_v31, %v3691_v60 }
 0x1dd   : > { %v1615_v20 = vadd.s32 1, %v3731_v43  ;;  %vm1880_vm3 = vcmp.gt.s32.totalorder %v1879_v36, 0  ;;  %v1869_v49 = vand.u32 2147483647, %v3694_v51  ;;  %vm1448_vm4 = vcmp.eq.s32.totalorder %v3696_v7, 2 }
 0x1de   : > { %v1736_v11 = vor.u32 %v1735_v14, %v1734_v55  ;;  %v1739_v40 = vshll.u32 %v1738_v48, 23  ;;  %v1881_v34 = vsel %vm1880_vm3, %v1879_v36, 0  ;;  %v1612_v17 = vmul.u32 %v3699_v23, %v1596_v27 }
 0x1df   : > { %vm1614_vm5 = vc.u32 %v3745_v44, %v3730_v28  ;;  %v1883_v58 = vand.u32 31, %v1881_v34  ;;  %v1750_v19 = vsel %vm3739_vm15, 0, %v1748_v46  ;;  %v281_v26 = vmul.f32 %v3608_v25, %v241_v37 }
 0x1e0   : > { %v2586_v42 = vpop.eup %2585  ;;  %v1740_v60 = vor.u32 4788187, %v1739_v40  ;;  %v1616_v15 = vsel %vm1614_vm5, %v1615_v20, %v3731_v43  ;;  %v3766_v54 = vmul.f32 %v3608_v25, %v256_v24  ;;  %v1743_v57 = vcvt.s32.f32 %v1736_v11 }
 0x1e1   : > { %v2588_v32 = vpop.eup %2587  ;;  %v1449_v53 = vxor.u32 2147483648, %v2586_v42  ;;  %v1617_v31 = vadd.s32 %v1616_v15, %v1612_v17  ;;  %v1884_v9 = vsub.s32 32, %v1883_v58  ;;  %v1876_v0 = vand.u32 8388607, %v1869_v49 }
 0x1e2   : > { %v1446_v23 = vxor.u32 2147483648, %v2588_v32  ;;  %v1741_v16 = vand.u32 2147483647, %v1740_v60  ;;  %v1754_v52 = vadd.s32 3, %v1750_v19  ;;  %v1882_v30 = vshrl.u32 %v1881_v34, 5 }
 0x1e3   : > { %v1450_v5 = vsel %vm1448_vm4, %v1449_v53, %v2588_v32  ;;  %v1618_v29 = vadd.s32 536870912, %v1617_v31  ;;  %v1887_v21 = vshrl.u32 %v2631_v61, %v1884_v9  ;;  %v1890_v6 = vshrl.u32 %v2632_v63, %v1884_v9 }
 0x1e4   : > { %v1447_v38 = vsel %vm1445_vm2, %v2586_v42, %v1446_v23  ;;  %v1744_v18 = vmul.f32 %v1743_v57, %v1741_v16  ;;  %v1886_v62 = vshll.u32 %v2630_v59, %v1883_v58  ;;  %v1893_v8 = vshrl.u32 %v2633_v1, %v1884_v9 }
 0x1e5   : > { %v1451_v39 = vsel %vm1444_vm0, %v1447_v38, %v1450_v5  ;;  %v1619_v13 = vshrl.u32 %v1618_v29, 30  ;;  %v1889_v50 = vshll.u32 %v2631_v61, %v1883_v58  ;;  %v1892_v10 = vshll.u32 %v2632_v63, %v1883_v58 }
 0x1e6   : > { %v1452_v45 = vsel %vm1441_vm1, nan, %v1451_v39  ;;  %v1745_v43 = vxor.u32 2147483648, %v1744_v18  ;;  %v1888_v35 = vor.u32 %v1887_v21, %v1886_v62  ;;  %v1895_v7 = vshll.u32 %v2633_v1, %v1883_v58 }
 0x1e7   : > { %2296 = vst.msk [vmem:[%s2967_s22 + $0x50] sm:$0xff] %vm2285_vm12, %v1452_v45  ;;  %v1620_v2 = vshll.u32 %v1619_v13, 30  ;;  %v1896_v36 = vshrl.u32 %v2634_v3, %v1884_v9  ;;  %v1891_v14 = vor.u32 %v1890_v6, %v1889_v50  ;;  %v1898_v4 = vshll.u32 %v2634_v3, %v1883_v58 }
 0x1e8   : > { %v1746_v55 = vsel %vm1663_vm14, %v1745_v43, %v1744_v18  ;;  %v1899_v48 = vshrl.u32 %v2635_v12, %v1884_v9  ;;  %v1894_v20 = vor.u32 %v1893_v8, %v1892_v10  ;;  %v1877_v11 = vor.u32 8388608, %v1876_v0 }
 0x1e9   : > { %v1749_v27 = vsel %vm3739_vm15, %v3528_v47, %v1746_v55  ;;  %v3795_v46 = vsub.s32 %v1617_v31, %v1620_v2  ;;  %v1897_v37 = vor.u32 %v1896_v36, %v1895_v7  ;;  %v3798_v34 = vadd.f32 %v3641_v41, %v281_v26 }
 0x1ea   : > { %2589 = vcosq.f32 %v1749_v27  ;;  %v1900_v40 = vor.u32 %v1899_v48, %v1898_v4  ;;  %vm1901_vm6 = vcmp.lt.s32.totalorder %v1882_v30, 1  ;;  %vm1904_vm7 = vcmp.lt.s32.totalorder %v1882_v30, 4 }
 0x1eb   : > { %2591 = vsinq.f32 %v1749_v27  ;;  %v1623_v24 = vsub.s32 0, %v3795_v46  ;;  %v1885_v17 = vshrl.u32 %v2630_v59, %v1884_v9  ;;  %vm1903_vm8 = vcmp.lt.s32.totalorder %v1882_v30, 3 }
 0x1ec   : > { %v1909_v33 = vsel %vm1901_vm6, %v1888_v35, %v1891_v14  ;;  %v1910_v58 = vsel %vm1904_vm7, %v1897_v37, 920167782  ;;  %vm1902_vm10 = vcmp.lt.s32.totalorder %v1882_v30, 2  ;;  %v1906_v60 = vsel %vm1904_vm7, %v1894_v20, 2102212464 }
 0x1ed   : > { %v2419_v42 = vmin.u32 %v1623_v24, %v3795_v46  ;;  %v1911_v19 = vsel %vm1903_vm8, %v1894_v20, %v1910_v58  ;;  %v1913_v26 = vsel %vm1901_vm6, %v1891_v14, %v1894_v20  ;;  %v1914_v32 = vsel %vm1904_vm7, %v1900_v40, 1326507024 }
 0x1ee   : > { %v1912_v15 = vsel %vm1902_vm10, %v1909_v33, %v1911_v19  ;;  %v1917_v53 = vshll.u32 %v1877_v11, 8  ;;  %v1755_v31 = vand.u32 3, %v1754_v52  ;;  %v1643_v16 = vsub.s32 4, %v1619_v13 }
 0x1ef   : > { %v1625_v23 = vclz %v2419_v42  ;;  %v1905_v9 = vsel %vm1901_vm6, %v1885_v17, %v1888_v35  ;;  %v1907_v57 = vsel %vm1903_vm8, %v1891_v14, %v1906_v60  ;;  %v1915_v0 = vsel %vm1903_vm8, %v1897_v37, %v1914_v32 }
 0x1f0   : > { %v3810_v5 = vmul.u32.u64.low %v1917_v53, %v1912_v15  ;;  %v3811_v29 = vmul.u32.u64.high %v1917_v53, %v1912_v15, %v3810_v5  ;;  %v1916_v38 = vsel %vm1902_vm10, %v1913_v26, %v1915_v0  ;;  %v1768_v18 = vand.u32 2139095040, %v3798_v34 }
 0x1f1   : > { %v2420_v21 = vadd.s32 4294967294, %v1625_v23  ;;  %vm3818_vm11 = vcmp.le.f32.partialorder %v1557_v22, 0.7853982  ;;  %vm1559_vm9 = vcmp.lt.s32.totalorder %v3644_v56, 0  ;;  %vm1756_vm13 = vcmp.lt.s32.totalorder %v1755_v31, 2 }
 0x1f2   : > { %v3823_v6 = vmul.u32.u64.low %v1917_v53, %v1916_v38  ;;  %v3824_v39 = vmul.u32.u64.high %v1917_v53, %v1916_v38, %v3823_v6  ;;  %v1644_v62 = vsel %vm1559_vm9, %v1643_v16, %v1619_v13  ;;  %v1908_v8 = vsel %vm1902_vm10, %v1905_v9, %v1907_v57 }
 0x1f3   : > { %vm2421_vm14 = vcmp.lt.s32.totalorder %v2420_v21, 0  ;;  %v1769_v45 = vshrl.u32 %v1768_v18, 23  ;;  %v1927_v50 = vadd.s32 1, %v3811_v29  ;;  %v1765_v22 = vand.u32 2147483647, %v3798_v34 }
 0x1f4   : > { %v1628_v43 = vsel %vm2421_vm14, 0, %v2420_v21  ;;  %v3833_v10 = vadd.f32 %v3641_v41, %v3766_v54  ;;  %v1613_v2 = vadd.s32 %v3730_v28, %v3745_v44  ;;  %v1646_v30 = vsel %vm3818_vm11, 0, %v1644_v62 }
 0x1f5   : > { %v1629_v35 = vsub.s32 32, %v1628_v43  ;;  %v1633_v7 = vsub.s32 4294967266, %v1628_v43  ;;  %v2426_v36 = vadd.s32 4294967169, %v1769_v45  ;;  %v1630_v13 = vshll.u32 %v3795_v46, %v1628_v43 }
 0x1f6   : > { %v1924_v55 = vmul.u32 %v1917_v53, %v1908_v8  ;;  %vm1926_vm15 = vc.u32 %v3824_v39, %v3810_v5  ;;  %vm1757_vm0 = vcmp.eq.s32.totalorder %v1755_v31, 0  ;;  %vm1760_vm1 = vcmp.eq.s32.totalorder %v1755_v31, 2 }
 0x1f7   : > { %v2590_v14 = vpop.eup %2589  ;;  %v1631_v4 = vshrl.u32 %v1613_v2, %v1629_v35  ;;  %v1634_v48 = vadd.s32 127, %v1633_v7  ;;  %v1928_v54 = vsel %vm1926_vm15, %v1927_v50, %v3811_v29  ;;  %v1775_v27 = vadd.s32 1, %v2426_v36 }
 0x1f8   : > { %v2592_v20 = vpop.eup %2591  ;;  %v1761_v28 = vxor.u32 2147483648, %v2590_v14  ;;  %v1929_v44 = vadd.s32 %v1928_v54, %v1924_v55  ;;  %v1650_v24 = vadd.s32 3, %v1646_v30  ;;  %v1772_v60 = vand.u32 8388607, %v1765_v22 }
 0x1f9   : > { %v1758_v37 = vxor.u32 2147483648, %v2592_v20  ;;  %v1632_v46 = vor.u32 %v1631_v4, %v1630_v13  ;;  %v1635_v11 = vshll.u32 %v1634_v48, 23  ;;  %vm1776_vm2 = vcmp.gt.s32.totalorder %v1775_v27, 0 }
 0x1fa   : > { %v1762_v40 = vsel %vm1760_vm1, %v1761_v28, %v2592_v20  ;;  %v1930_v17 = vadd.s32 536870912, %v1929_v44  ;;  %v1777_v33 = vsel %vm1776_vm2, %v1775_v27, 0  ;;  %v2080_v19 = vand.u32 2139095040, %v3833_v10 }
 0x1fb   : > { %v1759_v58 = vsel %vm1757_vm0, %v2590_v14, %v1758_v37  ;;  %v1636_v42 = vor.u32 4788187, %v1635_v11  ;;  %vm1753_vm3 = vweird.f32 %v3528_v47  ;;  %v1779_v32 = vand.u32 31, %v1777_v33 }
 0x1fc   : > { %v1763_v15 = vsel %vm1756_vm13, %v1759_v58, %v1762_v40  ;;  %v3848_v26 = vshrl.u32 %v1930_v17, 30  ;;  %v1639_v16 = vcvt.s32.f32 %v1632_v46  ;;  %v3853_v29 = vand.u32 3, %v1650_v24 }
 0x1fd   : > { %v1764_v53 = vsel %vm1753_vm3, nan, %v1763_v15  ;;  %v1637_v23 = vand.u32 2147483647, %v1636_v42  ;;  %v1780_v57 = vsub.s32 32, %v1779_v32  ;;  %v1773_v21 = vor.u32 8388608, %v1772_v60 }
 0x1fe   : > { %2299 = vst.msk [vmem:[%s2967_s22 + $0x68] sm:$0xff] %vm2285_vm12, %v1764_v53  ;;  %v1932_v9 = vshll.u32 %v3848_v26, 30  ;;  %v2081_v38 = vshrl.u32 %v2080_v19, 23  ;;  %v1778_v47 = vshrl.u32 %v1777_v33, 5  ;;  %v1782_v31 = vshll.u32 %v2630_v59, %v1779_v32 }
 0x1ff   : > { %v1640_v0 = vmul.f32 %v1639_v16, %v1637_v23  ;;  %v1783_v6 = vshrl.u32 %v2631_v61, %v1780_v57  ;;  %v1786_v8 = vshrl.u32 %v2632_v63, %v1780_v57  ;;  %v1788_v45 = vshll.u32 %v2632_v63, %v1779_v32 }
 0x200   : > { %v3855_v18 = vsub.s32 %v1929_v44, %v1932_v9  ;;  %v1789_v43 = vshrl.u32 %v2633_v1, %v1780_v57  ;;  %v1785_v2 = vshll.u32 %v2631_v61, %v1779_v32  ;;  %v1791_v35 = vshll.u32 %v2633_v1, %v1779_v32 }
 0x201   : > { %v1641_v62 = vxor.u32 2147483648, %v1640_v0  ;;  %v1792_v7 = vshrl.u32 %v2634_v3, %v1780_v57  ;;  %v1784_v13 = vor.u32 %v1783_v6, %v1782_v31  ;;  %v3868_v55 = vshll.u32 %v1773_v21, 8 }
 0x202   : > { %v1935_v50 = vsub.s32 0, %v3855_v18  ;;  %v1790_v30 = vor.u32 %v1789_v43, %v1788_v45  ;;  %v1787_v48 = vor.u32 %v1786_v8, %v1785_v2  ;;  %v1794_v27 = vshll.u32 %v2634_v3, %v1779_v32  ;;  %v251_v8 = vpop.permute.xlu0 %250 }
 0x203   : > { %v1642_v36 = vsel %vm1559_vm9, %v1641_v62, %v1640_v0  ;;  %v1793_v54 = vor.u32 %v1792_v7, %v1791_v35  ;;  %v1795_v20 = vshrl.u32 %v2635_v12, %v1780_v57  ;;  %v2438_v28 = vadd.s32 4294967169, %v2081_v38 }
 0x204   : > { %v1645_v14 = vsel %vm3818_vm11, %v3644_v56, %v1642_v36  ;;  %v2431_v4 = vmin.u32 %v1935_v50, %v3855_v18  ;;  %vm1797_vm4 = vcmp.lt.s32.totalorder %v1778_v47, 1  ;;  %vm1800_vm5 = vcmp.lt.s32.totalorder %v1778_v47, 4 }
 0x205   : > { %2593 = vcosq.f32 %v1645_v14  ;;  %v1781_v37 = vshrl.u32 %v2630_v59, %v1780_v57  ;;  %v1796_v46 = vor.u32 %v1795_v20, %v1794_v27  ;;  %vm1798_vm6 = vcmp.lt.s32.totalorder %v1778_v47, 2 }
 0x206   : > { %2595 = vsinq.f32 %v1645_v14  ;;  %v1937_v44 = vclz %v2431_v4  ;;  %v1802_v52 = vsel %vm1800_vm5, %v1790_v30, 2102212464  ;;  %vm1799_vm7 = vcmp.lt.s32.totalorder %v1778_v47, 3 }
 0x207   : > { %v1805_v40 = vsel %vm1797_vm4, %v1784_v13, %v1787_v48  ;;  %v1806_v24 = vsel %vm1800_vm5, %v1793_v54, 920167782  ;;  %v1801_v17 = vsel %vm1797_vm4, %v1781_v37, %v1784_v13  ;;  %v1809_v58 = vsel %vm1797_vm4, %v1787_v48, %v1790_v30 }
 0x208   : > { %v2432_v11 = vadd.s32 4294967294, %v1937_v44  ;;  %v1807_v33 = vsel %vm1799_vm7, %v1790_v30, %v1806_v24  ;;  %v1810_v42 = vsel %vm1800_vm5, %v1796_v46, 1326507024  ;;  %v1803_v60 = vsel %vm1799_vm7, %v1787_v48, %v1802_v52 }
 0x209   : > { %v1808_v19 = vsel %vm1798_vm6, %v1805_v40, %v1807_v33  ;;  %v1811_v15 = vsel %vm1799_vm7, %v1793_v54, %v1810_v42  ;;  %vm3880_vm10 = vcmp.le.f32.partialorder %v1869_v49, 0.7853982  ;;  %v1925_v57 = vadd.s32 %v3810_v5, %v3824_v39 }
 0x20a   : > { %vm2433_vm8 = vcmp.lt.s32.totalorder %v2432_v11, 0  ;;  %v1812_v23 = vsel %vm1798_vm6, %v1809_v58, %v1811_v15  ;;  %v3886_v16 = vmul.u32.u64.low %v3868_v55, %v1808_v19  ;;  %v3887_v9 = vmul.u32.u64.high %v3868_v55, %v1808_v19, %v3886_v16 }
 0x20b   : > { %v1940_v53 = vsel %vm2433_vm8, 0, %v2432_v11  ;;  %v2087_v38 = vadd.s32 1, %v2438_v28  ;;  %v1955_v31 = vsub.s32 4, %v3848_v26  ;;  %v1804_v49 = vsel %vm1798_vm6, %v1801_v17, %v1803_v60 }
 0x20c   : > { %v1941_v0 = vsub.s32 32, %v1940_v53  ;;  %v1945_v21 = vsub.s32 4294967266, %v1940_v53  ;;  %v3895_v6 = vmul.u32.u64.low %v3868_v55, %v1812_v23  ;;  %v3896_v62 = vmul.u32.u64.high %v3868_v55, %v1812_v23, %v3895_v6 }
 0x20d   : > { %v1942_v45 = vshll.u32 %v3855_v18, %v1940_v53  ;;  %vm2088_vm11 = vcmp.gt.s32.totalorder %v2087_v38, 0  ;;  %vm1649_vm9 = vweird.f32 %v3644_v56  ;;  %vm1871_vm13 = vcmp.lt.s32.totalorder %v3694_v51, 0 }
 0x20e   : > { %v1943_v43 = vshrl.u32 %v1925_v57, %v1941_v0  ;;  %v1946_v50 = vadd.s32 127, %v1945_v21  ;;  %v1823_v5 = vadd.s32 1, %v3887_v9  ;;  %v2077_v39 = vand.u32 2147483647, %v3833_v10 }
 0x20f   : > { %v2089_v47 = vsel %vm2088_vm11, %v2087_v38, 0  ;;  %v283_v36 = vmul.f32 %v3608_v25, %v251_v8  ;;  %vm1652_vm14 = vcmp.lt.s32.totalorder %v3853_v29, 2  ;;  %v1956_v18 = vsel %vm1871_vm13, %v1955_v31, %v3848_v26 }
 0x210   : > { %v1944_v2 = vor.u32 %v1943_v43, %v1942_v45  ;;  %v1947_v35 = vshll.u32 %v1946_v50, 23  ;;  %v2091_v7 = vand.u32 31, %v2089_v47  ;;  %v1820_v13 = vmul.u32 %v3868_v55, %v1804_v49 }
 0x211   : > { %vm1822_vm15 = vc.u32 %v3896_v62, %v3886_v16  ;;  %vm1653_vm0 = vcmp.eq.s32.totalorder %v3853_v29, 0  ;;  %vm1656_vm1 = vcmp.eq.s32.totalorder %v3853_v29, 2  ;;  %v2084_v26 = vand.u32 8388607, %v2077_v39 }
 0x212   : > { %v2594_v30 = vpop.eup %2593  ;;  %v1948_v14 = vor.u32 4788187, %v1947_v35  ;;  %v1824_v4 = vsel %vm1822_vm15, %v1823_v5, %v3887_v9  ;;  %v2092_v48 = vsub.s32 32, %v2091_v7  ;;  %v1951_v44 = vcvt.s32.f32 %v1944_v2 }
 0x213   : > { %v2596_v54 = vpop.eup %2595  ;;  %v1657_v27 = vxor.u32 2147483648, %v2594_v30  ;;  %v1825_v20 = vadd.s32 %v1824_v4, %v1820_v13  ;;  %v1958_v37 = vsel %vm3880_vm10, 0, %v1956_v18  ;;  %v3918_v11 = vshrl.u32 %v2089_v47, 5 }
 0x214   : > { %v1654_v28 = vxor.u32 2147483648, %v2596_v54  ;;  %v1949_v55 = vand.u32 2147483647, %v1948_v14  ;;  %v2095_v40 = vshrl.u32 %v2631_v61, %v2092_v48  ;;  %v2094_v33 = vshll.u32 %v2630_v59, %v2091_v7 }
 0x215   : > { %v1658_v46 = vsel %vm1656_vm1, %v1657_v27, %v2596_v54  ;;  %v1826_v52 = vadd.s32 536870912, %v1825_v20  ;;  %v2098_v58 = vshrl.u32 %v2632_v63, %v2092_v48  ;;  %v2097_v19 = vshll.u32 %v2631_v61, %v2091_v7 }
 0x216   : > { %v1655_v24 = vsel %vm1653_vm0, %v2594_v30, %v1654_v28  ;;  %v1952_v17 = vmul.f32 %v1951_v44, %v1949_v55  ;;  %v2101_v15 = vshrl.u32 %v2633_v1, %v2092_v48  ;;  %v2103_v9 = vshll.u32 %v2633_v1, %v2091_v7  ;;  %v261_v28 = vpop.permute.xlu0 %260 }
 0x217   : > { %v1659_v42 = vsel %vm1652_vm14, %v1655_v24, %v1658_v46  ;;  %v3927_v60 = vshrl.u32 %v1826_v52, 30  ;;  %v2104_v57 = vshrl.u32 %v2634_v3, %v2092_v48  ;;  %v2096_v29 = vor.u32 %v2095_v40, %v2094_v33 }
 0x218   : > { %v1660_v53 = vsel %vm1649_vm9, nan, %v1659_v42  ;;  %v1953_v23 = vxor.u32 2147483648, %v1952_v17  ;;  %v2100_v21 = vshll.u32 %v2632_v63, %v2091_v7  ;;  %v2107_v38 = vshrl.u32 %v2635_v12, %v2092_v48 }
 0x219   : > { %2298 = vst.msk [vmem:[%s2967_s22 + $0x60] sm:$0xff] %vm2285_vm12, %v1660_v53  ;;  %v1828_v0 = vshll.u32 %v3927_v60, 30  ;;  %v2099_v49 = vor.u32 %v2098_v58, %v2097_v19  ;;  %v2105_v56 = vor.u32 %v2104_v57, %v2103_v9  ;;  %v2106_v6 = vshll.u32 %v2634_v3, %v2091_v7 }
 0x21a   : > { %v1954_v31 = vsel %vm1871_vm13, %v1953_v23, %v1952_v17  ;;  %v2085_v43 = vor.u32 8388608, %v2084_v26  ;;  %v2102_v50 = vor.u32 %v2101_v15, %v2100_v21  ;;  %v1962_v5 = vadd.s32 3, %v1958_v37 }
 0x21b   : > { %v1957_v8 = vsel %vm3880_vm10, %v3694_v51, %v1954_v31  ;;  %v3946_v45 = vsub.s32 %v1825_v20, %v1828_v0  ;;  %v2108_v47 = vor.u32 %v2107_v38, %v2106_v6  ;;  %v3949_v2 = vadd.f32 %v3641_v41, %v283_v36 }
 0x21c   : > { %2597 = vcosq.f32 %v1957_v8  ;;  %vm2109_vm2 = vcmp.lt.s32.totalorder %v3918_v11, 1  ;;  %vm2112_vm3 = vcmp.lt.s32.totalorder %v3918_v11, 4  ;;  %v2093_v32 = vshrl.u32 %v2630_v59, %v2092_v48 }
 0x21d   : > { %2599 = vsinq.f32 %v1957_v8  ;;  %v1831_v35 = vsub.s32 0, %v3946_v45  ;;  %vm2111_vm4 = vcmp.lt.s32.totalorder %v3918_v11, 3  ;;  %v2117_v7 = vsel %vm2109_vm2, %v2096_v29, %v2099_v49 }
 0x21e   : > { %v2118_v18 = vsel %vm2112_vm3, %v2105_v56, 920167782  ;;  %vm2110_vm5 = vcmp.lt.s32.totalorder %v3918_v11, 2  ;;  %v2114_v36 = vsel %vm2112_vm3, %v2102_v50, 2102212464  ;;  %v2121_v4 = vsel %vm2109_vm2, %v2099_v49, %v2102_v50 }
 0x21f   : > { %v2427_v13 = vmin.u32 %v1831_v35, %v3946_v45  ;;  %v2119_v30 = vsel %vm2111_vm4, %v2102_v50, %v2118_v18  ;;  %v2122_v48 = vsel %vm2112_vm3, %v2108_v47, 1326507024  ;;  %v2125_v54 = vshll.u32 %v2085_v43, 8 }
 0x220   : > { %v2120_v14 = vsel %vm2110_vm5, %v2117_v7, %v2119_v30  ;;  %v1963_v27 = vand.u32 3, %v1962_v5  ;;  %v2113_v26 = vsel %vm2109_vm2, %v2093_v32, %v2096_v29  ;;  %v2115_v55 = vsel %vm2111_vm4, %v2099_v49, %v2114_v36 }
 0x221   : > { %v1833_v20 = vclz %v2427_v13  ;;  %v2123_v44 = vsel %vm2111_vm4, %v2105_v56, %v2122_v48  ;;  %v3972_v37 = vmul.u32.u64.low %v2125_v54, %v2120_v14  ;;  %v3973_v46 = vmul.u32.u64.high %v2125_v54, %v2120_v14, %v3972_v37 }
 0x222   : > { %v2124_v40 = vsel %vm2110_vm5, %v2121_v4, %v2123_v44  ;;  %v1976_v24 = vand.u32 2139095040, %v3949_v2  ;;  %vm1767_vm6 = vcmp.lt.s32.totalorder %v3798_v34, 0  ;;  %v285_v58 = vmul.f32 %v3608_v25, %v261_v28 }
 0x223   : > { %v2428_v52 = vadd.s32 4294967294, %v1833_v20  ;;  %v3980_v17 = vmul.u32.u64.low %v2125_v54, %v2124_v40  ;;  %v3981_v33 = vmul.u32.u64.high %v2125_v54, %v2124_v40, %v3980_v17  ;;  %vm1964_vm7 = vcmp.lt.s32.totalorder %v1963_v27, 2 }
 0x224   : > { %vm3986_vm8 = vcmp.le.f32.partialorder %v1765_v22, 0.7853982  ;;  %v2116_v19 = vsel %vm2110_vm5, %v2113_v26, %v2115_v55  ;;  %v1977_v15 = vshrl.u32 %v1976_v24, 23  ;;  %vm1961_vm11 = vweird.f32 %v3694_v51 }
 0x225   : > { %vm2429_vm10 = vcmp.lt.s32.totalorder %v2428_v52, 0  ;;  %v1821_v53 = vadd.s32 %v3886_v16, %v3896_v62  ;;  %v1851_v25 = vsub.s32 4, %v3927_v60  ;;  %v2135_v9 = vadd.s32 1, %v3973_v46 }
 0x226   : > { %v1836_v23 = vsel %vm2429_vm10, 0, %v2428_v52  ;;  %v1973_v0 = vand.u32 2147483647, %v3949_v2  ;;  %v2434_v29 = vadd.s32 4294967169, %v1977_v15  ;;  %v2132_v11 = vmul.u32 %v2125_v54, %v2116_v19 }
 0x227   : > { %v1837_v57 = vsub.s32 32, %v1836_v23  ;;  %v1841_v22 = vsub.s32 4294967266, %v1836_v23  ;;  %v1838_v21 = vshll.u32 %v3946_v45, %v1836_v23  ;;  %vm2134_vm9 = vc.u32 %v3981_v33, %v3972_v37 }
 0x228   : > { %v4002_v38 = vadd.f32 %v3641_v41, %v285_v58  ;;  %v2136_v49 = vsel %vm2134_vm9, %v2135_v9, %v3973_v46  ;;  %v1983_v56 = vadd.s32 1, %v2434_v29  ;;  %vm1968_vm13 = vcmp.eq.s32.totalorder %v1963_v27, 2 }
 0x229   : > { %v2598_v16 = vpop.eup %2597  ;;  %v1839_v62 = vshrl.u32 %v1821_v53, %v1837_v57  ;;  %v1842_v31 = vadd.s32 127, %v1841_v22  ;;  %v1852_v45 = vsel %vm1767_vm6, %v1851_v25, %v3927_v60  ;;  %v2137_v43 = vadd.s32 %v2136_v49, %v2132_v11 }
 0x22a   : > { %v2600_v6 = vpop.eup %2599  ;;  %v1969_v8 = vxor.u32 2147483648, %v2598_v16  ;;  %vm1984_vm14 = vcmp.gt.s32.totalorder %v1983_v56, 0  ;;  %vm1965_vm15 = vcmp.eq.s32.totalorder %v1963_v27, 0  ;;  %v1980_v13 = vand.u32 8388607, %v1973_v0 }
 0x22b   : > { %v1966_v50 = vxor.u32 2147483648, %v2600_v6  ;;  %v1840_v5 = vor.u32 %v1839_v62, %v1838_v21  ;;  %v1843_v47 = vshll.u32 %v1842_v31, 23  ;;  %v2138_v35 = vadd.s32 536870912, %v2137_v43 }
 0x22c   : > { %v1970_v41 = vsel %vm1968_vm13, %v1969_v8, %v2600_v6  ;;  %v1985_v32 = vsel %vm1984_vm14, %v1983_v56, 0  ;;  %v2184_v36 = vand.u32 2139095040, %v4002_v38  ;;  %v1854_v60 = vsel %vm3986_vm8, 0, %v1852_v45 }
 0x22d   : > { %v1967_v7 = vsel %vm1965_vm15, %v2598_v16, %v1966_v50  ;;  %v1844_v18 = vor.u32 4788187, %v1843_v47  ;;  %v4014_v14 = vshrl.u32 %v2138_v35, 30  ;;  %v1987_v4 = vand.u32 31, %v1985_v32 }
 0x22e   : > { %v1971_v30 = vsel %vm1964_vm7, %v1967_v7, %v1970_v41  ;;  %v1847_v20 = vcvt.s32.f32 %v1840_v5  ;;  %v1858_v44 = vadd.s32 3, %v1854_v60  ;;  %v1981_v27 = vor.u32 8388608, %v1980_v13 }
 0x22f   : > { %v1972_v48 = vsel %vm1961_vm11, nan, %v1971_v30  ;;  %v1845_v54 = vand.u32 2147483647, %v1844_v18  ;;  %v2140_v26 = vshll.u32 %v4014_v14, 30  ;;  %v1988_v28 = vsub.s32 32, %v1987_v4 }
 0x230   : > { %2301 = vst.msk [vmem:[%s2967_s22 + $0x78] sm:$0xff] %vm2285_vm12, %v1972_v48  ;;  %v2185_v46 = vshrl.u32 %v2184_v36, 23  ;;  %v1986_v40 = vshrl.u32 %v1985_v32, 5  ;;  %v1990_v24 = vshll.u32 %v2630_v59, %v1987_v4  ;;  %v1996_v19 = vshll.u32 %v2632_v63, %v1987_v4 }
 0x231   : > { %v1848_v55 = vmul.f32 %v1847_v20, %v1845_v54  ;;  %v4021_v52 = vsub.s32 %v2137_v43, %v2140_v26  ;;  %v1991_v17 = vshrl.u32 %v2631_v61, %v1988_v28  ;;  %v1994_v58 = vshrl.u32 %v2632_v63, %v1988_v28 }
 0x232   : > { %v1997_v15 = vshrl.u32 %v2633_v1, %v1988_v28  ;;  %v1993_v23 = vshll.u32 %v2631_v61, %v1987_v4  ;;  %v1999_v25 = vshll.u32 %v2633_v1, %v1987_v4  ;;  %v2000_v9 = vshrl.u32 %v2634_v3, %v1988_v28 }
 0x233   : > { %v1849_v51 = vxor.u32 2147483648, %v1848_v55  ;;  %v2143_v53 = vsub.s32 0, %v4021_v52  ;;  %v1992_v22 = vor.u32 %v1991_v17, %v1990_v24  ;;  %v4034_v21 = vshll.u32 %v1981_v27, 8 }
 0x234   : > { %v1998_v29 = vor.u32 %v1997_v15, %v1996_v19  ;;  %v1995_v62 = vor.u32 %v1994_v58, %v1993_v23  ;;  %v2001_v31 = vor.u32 %v2000_v9, %v1999_v25  ;;  %v2002_v49 = vshll.u32 %v2634_v3, %v1987_v4 }
 0x235   : > { %v1850_v57 = vsel %vm1767_vm6, %v1849_v51, %v1848_v55  ;;  %v2439_v16 = vmin.u32 %v2143_v53, %v4021_v52  ;;  %v2003_v56 = vshrl.u32 %v2635_v12, %v1988_v28  ;;  %v2442_v6 = vadd.s32 4294967169, %v2185_v46 }
 0x236   : > { %v1853_v11 = vsel %vm3986_vm8, %v3798_v34, %v1850_v57  ;;  %vm2005_vm0 = vcmp.lt.s32.totalorder %v1986_v40, 1  ;;  %vm2008_vm1 = vcmp.lt.s32.totalorder %v1986_v40, 4  ;;  %v1989_v45 = vshrl.u32 %v2630_v59, %v1988_v28 }
 0x237   : > { %2601 = vcosq.f32 %v1853_v11  ;;  %v2145_v8 = vclz %v2439_v16  ;;  %v2004_v43 = vor.u32 %v2003_v56, %v2002_v49  ;;  %vm2006_vm2 = vcmp.lt.s32.totalorder %v1986_v40, 2 }
 0x238   : > { %2603 = vsinq.f32 %v1853_v11  ;;  %v2010_v42 = vsel %vm2008_vm1, %v1998_v29, 2102212464  ;;  %vm2007_vm3 = vcmp.lt.s32.totalorder %v1986_v40, 3  ;;  %v2013_v5 = vsel %vm2005_vm0, %v1992_v22, %v1995_v62 }
 0x239   : > { %v2440_v50 = vadd.s32 4294967294, %v2145_v8  ;;  %v2014_v47 = vsel %vm2008_vm1, %v2001_v31, 920167782  ;;  %v2009_v41 = vsel %vm2005_vm0, %v1989_v45, %v1992_v22  ;;  %v2017_v32 = vsel %vm2005_vm0, %v1995_v62, %v1998_v29 }
 0x23a   : > { %v2015_v35 = vsel %vm2007_vm3, %v1998_v29, %v2014_v47  ;;  %v2018_v7 = vsel %vm2008_vm1, %v2004_v43, 1326507024  ;;  %v2011_v18 = vsel %vm2007_vm3, %v1995_v62, %v2010_v42  ;;  %v2133_v54 = vadd.s32 %v3972_v37, %v3981_v33 }
 0x23b   : > { %vm2441_vm4 = vcmp.lt.s32.totalorder %v2440_v50, 0  ;;  %v2016_v13 = vsel %vm2006_vm2, %v2013_v5, %v2015_v35  ;;  %v2019_v36 = vsel %vm2007_vm3, %v2001_v31, %v2018_v7  ;;  %v1859_v28 = vand.u32 3, %v1858_v44 }
 0x23c   : > { %v2148_v30 = vsel %vm2441_vm4, 0, %v2440_v50  ;;  %v2020_v60 = vsel %vm2006_vm2, %v2017_v32, %v2019_v36  ;;  %v4046_v4 = vmul.u32.u64.low %v4034_v21, %v2016_v13  ;;  %v4047_v48 = vmul.u32.u64.high %v4034_v21, %v2016_v13, %v4046_v4 }
 0x23d   : > { %v2149_v20 = vsub.s32 32, %v2148_v30  ;;  %v2153_v26 = vsub.s32 4294967266, %v2148_v30  ;;  %v4053_v55 = vmul.u32.u64.low %v4034_v21, %v2020_v60  ;;  %v4054_v27 = vmul.u32.u64.high %v4034_v21, %v2020_v60, %v4053_v55 }
 0x23e   : > { %v2191_v46 = vadd.s32 1, %v2442_v6  ;;  %v2150_v24 = vshll.u32 %v4021_v52, %v2148_v30  ;;  %v2012_v58 = vsel %vm2006_vm2, %v2009_v41, %v2011_v18  ;;  %vm1857_vm5 = vweird.f32 %v3798_v34 }
 0x23f   : > { %v2151_v17 = vshrl.u32 %v2133_v54, %v2149_v20  ;;  %v2154_v51 = vadd.s32 127, %v2153_v26  ;;  %vm2079_vm6 = vcmp.lt.s32.totalorder %v3833_v10, 0  ;;  %v2031_v37 = vadd.s32 1, %v4047_v48 }
 0x240   : > { %vm2192_vm7 = vcmp.gt.s32.totalorder %v2191_v46, 0  ;;  %v2181_v19 = vand.u32 2147483647, %v4002_v38  ;;  %v2163_v53 = vsub.s32 4, %v4014_v14  ;;  %v2028_v52 = vmul.u32 %v4034_v21, %v2012_v58 }
 0x241   : > { %v2152_v33 = vor.u32 %v2151_v17, %v2150_v24  ;;  %v2155_v44 = vshll.u32 %v2154_v51, 23  ;;  %v2193_v15 = vsel %vm2192_vm7, %v2191_v46, 0  ;;  %vm2030_vm8 = vc.u32 %v4054_v27, %v4046_v4 }
 0x242   : > { %v2195_v40 = vand.u32 31, %v2193_v15  ;;  %vm1860_vm10 = vcmp.lt.s32.totalorder %v1859_v28, 2  ;;  %vm1861_vm11 = vcmp.eq.s32.totalorder %v1859_v28, 0  ;;  %vm4068_vm9 = vcmp.le.f32.partialorder %v2077_v39, 0.7853982 }
 0x243   : > { %v2156_v9 = vor.u32 4788187, %v2155_v44  ;;  %v2032_v57 = vsel %vm2030_vm8, %v2031_v37, %v4047_v48  ;;  %vm1864_vm13 = vcmp.eq.s32.totalorder %v1859_v28, 2  ;;  %v2159_v31 = vcvt.s32.f32 %v2152_v33 }
 0x244   : > { %v2602_v23 = vpop.eup %2601  ;;  %v2033_v21 = vadd.s32 %v2032_v57, %v2028_v52  ;;  %v2196_v11 = vsub.s32 32, %v2195_v40  ;;  %v2188_v49 = vand.u32 8388607, %v2181_v19  ;;  %v2164_v39 = vsel %vm2079_vm6, %v2163_v53, %v4014_v14 }
 0x245   : > { %v2604_v22 = vpop.eup %2603  ;;  %v1865_v29 = vxor.u32 2147483648, %v2602_v23  ;;  %v2157_v62 = vand.u32 2147483647, %v2156_v9  ;;  %v2194_v42 = vshrl.u32 %v2193_v15, 5  ;;  %v2198_v41 = vshll.u32 %v2630_v59, %v2195_v40 }
 0x246   : > { %v1862_v16 = vxor.u32 2147483648, %v2604_v22  ;;  %v2034_v6 = vadd.s32 536870912, %v2033_v21  ;;  %v2199_v8 = vshrl.u32 %v2631_v61, %v2196_v11  ;;  %v2202_v50 = vshrl.u32 %v2632_v63, %v2196_v11 }
 0x247   : > { %v1866_v56 = vsel %vm1864_vm13, %v1865_v29, %v2604_v22  ;;  %v2160_v43 = vmul.f32 %v2159_v31, %v2157_v62  ;;  %v2205_v35 = vshrl.u32 %v2633_v1, %v2196_v11  ;;  %v2201_v7 = vshll.u32 %v2631_v61, %v2195_v40 }
 0x248   : > { %v1863_v45 = vsel %vm1861_vm11, %v2602_v23, %v1862_v16  ;;  %v4082_v47 = vshrl.u32 %v2034_v6, 30  ;;  %v2204_v18 = vshll.u32 %v2632_v63, %v2195_v40  ;;  %v2200_v36 = vor.u32 %v2199_v8, %v2198_v41 }
 0x249   : > { %v1867_v5 = vsel %vm1860_vm10, %v1863_v45, %v1866_v56  ;;  %v2161_v32 = vxor.u32 2147483648, %v2160_v43  ;;  %v2207_v30 = vshll.u32 %v2633_v1, %v2195_v40  ;;  %v2208_v60 = vshrl.u32 %v2634_v3, %v2196_v11 }
 0x24a   : > { %v1868_v14 = vsel %vm1857_vm5, nan, %v1867_v5  ;;  %v2036_v13 = vshll.u32 %v4082_v47, 30  ;;  %v2203_v54 = vor.u32 %v2202_v50, %v2201_v7  ;;  %v2210_v34 = vshll.u32 %v2634_v3, %v2195_v40 }
 0x24b   : > { %2300 = vst.msk [vmem:[%s2967_s22 + $0x70] sm:$0xff] %vm2285_vm12, %v1868_v14  ;;  %v2162_v48 = vsel %vm2079_vm6, %v2161_v32, %v2160_v43  ;;  %v2211_v20 = vshrl.u32 %v2635_v12, %v2196_v11  ;;  %v2206_v26 = vor.u32 %v2205_v35, %v2204_v18  ;;  %v2209_v28 = vor.u32 %v2208_v60, %v2207_v30 }
 0x24c   : > { %v2165_v61 = vsel %vm4068_vm9, %v3833_v10, %v2162_v48  ;;  %v2037_v63 = vsub.s32 %v2033_v21, %v2036_v13  ;;  %v2166_v1 = vsel %vm4068_vm9, 0, %v2164_v39  ;;  %v2189_v55 = vor.u32 8388608, %v2188_v49 }
 0x24d   : > { %2605 = vcosq.f32 %v2165_v61  ;;  %v2212_v46 = vor.u32 %v2211_v20, %v2210_v34  ;;  %vm2213_vm14 = vcmp.lt.s32.totalorder %v2194_v42, 1  ;;  %vm2216_vm15 = vcmp.lt.s32.totalorder %v2194_v42, 4 }
 0x24e   : > { %2607 = vsinq.f32 %v2165_v61  ;;  %v2039_v24 = vsub.s32 0, %v2037_v63  ;;  %v2197_v3 = vshrl.u32 %v2630_v59, %v2196_v11  ;;  %vm2215_vm0 = vcmp.lt.s32.totalorder %v2194_v42, 3 }
 0x24f   : > { %v2221_v12 = vsel %vm2213_vm14, %v2200_v36, %v2203_v54  ;;  %v2222_v17 = vsel %vm2216_vm15, %v2209_v28, 920167782  ;;  %vm2214_vm1 = vcmp.lt.s32.totalorder %v2194_v42, 2  ;;  %v2218_v58 = vsel %vm2216_vm15, %v2206_v26, 2102212464 }
 0x250   : > { %v2435_v51 = vmin.u32 %v2039_v24, %v2037_v63  ;;  %v2223_v37 = vsel %vm2215_vm0, %v2206_v26, %v2222_v17  ;;  %v2225_v44 = vsel %vm2213_vm14, %v2203_v54, %v2206_v26  ;;  %v2226_v15 = vsel %vm2216_vm15, %v2212_v46, 1326507024 }
 0x251   : > { %v2224_v33 = vsel %vm2214_vm1, %v2221_v12, %v2223_v37  ;;  %v2229_v53 = vshll.u32 %v2189_v55, 8  ;;  %v2217_v40 = vsel %vm2213_vm14, %v2197_v3, %v2200_v36  ;;  %v2219_v23 = vsel %vm2215_vm0, %v2203_v54, %v2218_v58 }
 0x252   : > { %v2041_v52 = vclz %v2435_v51  ;;  %v2227_v25 = vsel %vm2215_vm0, %v2209_v28, %v2226_v15  ;;  %v2170_v59 = vadd.s32 3, %v2166_v1  ;;  %v2220_v16 = vsel %vm2214_vm1, %v2217_v40, %v2219_v23 }
 0x253   : > { %v4106_v9 = vmul.u32.u64.low %v2229_v53, %v2224_v33  ;;  %v4107_v57 = vmul.u32.u64.high %v2229_v53, %v2224_v33, %v4106_v9  ;;  %v2228_v29 = vsel %vm2214_vm1, %v2225_v44, %v2227_v25  ;;  %v2029_v56 = vadd.s32 %v4046_v4, %v4054_v27 }
 0x254   : > { %v2436_v22 = vadd.s32 4294967294, %v2041_v52  ;;  %v4110_v21 = vmul.u32.u64.low %v2229_v53, %v2228_v29  ;;  %v4111_v11 = vmul.u32.u64.high %v2229_v53, %v2228_v29, %v4110_v21  ;;  %v2171_v49 = vand.u32 3, %v2170_v59 }
 0x255   : > { %v2239_v31 = vadd.s32 1, %v4107_v57  ;;  %v2236_v8 = vmul.u32 %v2229_v53, %v2220_v16  ;;  %vm2169_vm7 = vweird.f32 %v3833_v10  ;;  %vm1975_vm8 = vcmp.lt.s32.totalorder %v3949_v2, 0 }
 0x256   : > { %vm2437_vm2 = vcmp.lt.s32.totalorder %v2436_v22, 0  ;;  %vm2238_vm3 = vc.u32 %v4111_v11, %v4106_v9  ;;  %vm2176_vm4 = vcmp.eq.s32.totalorder %v2171_v49, 2  ;;  %vm2173_vm5 = vcmp.eq.s32.totalorder %v2171_v49, 0 }
 0x257   : > { %v2044_v62 = vsel %vm2437_vm2, 0, %v2436_v22  ;;  %v2240_v41 = vsel %vm2238_vm3, %v2239_v31, %v4107_v57  ;;  %vm2172_vm6 = vcmp.lt.s32.totalorder %v2171_v49, 2  ;;  %v2059_v28 = vsub.s32 4, %v4082_v47 }
 0x258   : > { %v2045_v39 = vsub.s32 32, %v2044_v62  ;;  %v2049_v6 = vsub.s32 4294967266, %v2044_v62  ;;  %v2046_v43 = vshll.u32 %v2037_v63, %v2044_v62  ;;  %v2241_v14 = vadd.s32 %v2240_v41, %v2236_v8 }
 0x259   : > { %vm1974_vm10 = vcmp.le.f32.partialorder %v1973_v0, 0.7853982  ;;  %v2060_v24 = vsel %vm1975_vm8, %v2059_v28, %v4082_v47  ;;  %v2237_v37 = vadd.s32 %v4106_v9, %v4111_v11  ;;  %vm2065_vm15 = vweird.f32 %v3949_v2 }
 0x25a   : > { %v2606_v45 = vpop.eup %2605  ;;  %v2047_v50 = vshrl.u32 %v2029_v56, %v2045_v39  ;;  %v2050_v5 = vadd.s32 127, %v2049_v6  ;;  %v2242_v27 = vadd.s32 536870912, %v2241_v14  ;;  %v2062_v17 = vsel %vm1974_vm10, 0, %v2060_v24 }
 0x25b   : > { %v2608_v42 = vpop.eup %2607  ;;  %v2177_v35 = vxor.u32 2147483648, %v2606_v45  ;;  %v2066_v58 = vadd.s32 3, %v2062_v17  ;;  %vm2183_vm0 = vcmp.lt.s32.totalorder %v4002_v38, 0  ;;  %vm2182_vm1 = vcmp.le.f32.partialorder %v2181_v19, 0.7853982 }
 0x25c   : > { %v2174_v32 = vxor.u32 2147483648, %v2608_v42  ;;  %v2048_v7 = vor.u32 %v2047_v50, %v2046_v43  ;;  %v2051_v18 = vshll.u32 %v2050_v5, 23  ;;  %v2243_v60 = vshrl.u32 %v2242_v27, 30 }
 0x25d   : > { %v2178_v4 = vsel %vm2176_vm4, %v2177_v35, %v2608_v42  ;;  %v2067_v52 = vand.u32 3, %v2066_v58 }
 0x25e   : > { %v2175_v13 = vsel %vm2173_vm5, %v2606_v45, %v2174_v32  ;;  %v2052_v36 = vor.u32 4788187, %v2051_v18  ;;  %v2055_v34 = vcvt.s32.f32 %v2048_v7  ;;  %v2244_v20 = vshll.u32 %v2243_v60, 30 }
 0x25f   : > { %v2179_v30 = vsel %vm2172_vm6, %v2175_v13, %v2178_v4  ;;  %vm2072_vm9 = vcmp.eq.s32.totalorder %v2067_v52, 2  ;;  %vm2069_vm13 = vcmp.eq.s32.totalorder %v2067_v52, 0  ;;  %vm2068_vm14 = vcmp.lt.s32.totalorder %v2067_v52, 2 }
 0x260   : > { %v2180_v48 = vsel %vm2169_vm7, nan, %v2179_v30  ;;  %v2053_v54 = vand.u32 2147483647, %v2052_v36  ;;  %v2245_v63 = vsub.s32 %v2241_v14, %v2244_v20  ;;  %v2267_v56 = vsub.s32 4, %v2243_v60 }
 0x261   : > { %2303 = vst.msk [vmem:[%s2967_s22 + $0x88] sm:$0xff] %vm2285_vm12, %v2180_v48  ;;  %vm2273_vm5 = vweird.f32 %v4002_v38 }
 0x262   : > { %v2056_v61 = vmul.f32 %v2055_v34, %v2053_v54  ;;  %v2247_v1 = vsub.s32 0, %v2245_v63  ;;  %v2268_v8 = vsel %vm2183_vm0, %v2267_v56, %v2243_v60 }
 0x263   : > { %v2270_v45 = vsel %vm2182_vm1, 0, %v2268_v8 }
 0x264   : > { %v2057_v26 = vxor.u32 2147483648, %v2056_v61  ;;  %v2443_v46 = vmin.u32 %v2247_v1, %v2245_v63 }
 0x266   : > { %v2058_v10 = vsel %vm1975_vm8, %v2057_v26, %v2056_v61  ;;  %v2249_v3 = vclz %v2443_v46 }
 0x267   : > { %v2061_v55 = vsel %vm1974_vm10, %v3949_v2, %v2058_v10  ;;  %v2274_v2 = vadd.s32 3, %v2270_v45 }
 0x268   : > { %2609 = vcosq.f32 %v2061_v55  ;;  %v2444_v12 = vadd.s32 4294967294, %v2249_v3 }
 0x269   : > { %2611 = vsinq.f32 %v2061_v55  ;;  %v2275_v43 = vand.u32 3, %v2274_v2 }
 0x26a   : > { %vm2445_vm11 = vcmp.lt.s32.totalorder %v2444_v12, 0 }
 0x26b   : > { %v2252_v51 = vsel %vm2445_vm11, 0, %v2444_v12  ;;  %vm2280_vm2 = vcmp.eq.s32.totalorder %v2275_v43, 2  ;;  %vm2277_vm3 = vcmp.eq.s32.totalorder %v2275_v43, 0  ;;  %vm2276_vm4 = vcmp.lt.s32.totalorder %v2275_v43, 2 }
 0x26c   : > { %v2253_v33 = vsub.s32 32, %v2252_v51  ;;  %v2257_v44 = vsub.s32 4294967266, %v2252_v51  ;;  %v2254_v15 = vshll.u32 %v2245_v63, %v2252_v51 }
 0x26e   : > { %v2255_v0 = vshrl.u32 %v2237_v37, %v2253_v33  ;;  %v2258_v53 = vadd.s32 127, %v2257_v44 }
 0x270   : > { %v2256_v40 = vor.u32 %v2255_v0, %v2254_v15  ;;  %v2259_v23 = vshll.u32 %v2258_v53, 23 }
 0x272   : > { %v2260_v57 = vor.u32 4788187, %v2259_v23  ;;  %v2263_v21 = vcvt.s32.f32 %v2256_v40 }
 0x274   : > { %v2261_v29 = vand.u32 2147483647, %v2260_v57 }
 0x275   : > { %v2610_v25 = vpop.eup %2609 }
 0x276   : > { %v2612_v47 = vpop.eup %2611  ;;  %v2073_v59 = vxor.u32 2147483648, %v2610_v25  ;;  %v2264_v11 = vmul.f32 %v2263_v21, %v2261_v29 }
 0x277   : > { %v2070_v22 = vxor.u32 2147483648, %v2612_v47 }
 0x278   : > { %v2074_v16 = vsel %vm2072_vm9, %v2073_v59, %v2612_v47  ;;  %v2265_v49 = vxor.u32 2147483648, %v2264_v11 }
 0x279   : > { %v2071_v9 = vsel %vm2069_vm13, %v2610_v25, %v2070_v22 }
 0x27a   : > { %v2075_v62 = vsel %vm2068_vm14, %v2071_v9, %v2074_v16  ;;  %v2266_v39 = vsel %vm2183_vm0, %v2265_v49, %v2264_v11 }
 0x27b   : > { %v2076_v31 = vsel %vm2065_vm15, nan, %v2075_v62  ;;  %v2269_v6 = vsel %vm2182_vm1, %v4002_v38, %v2266_v39 }
 0x27c   : > { %2302 = vst.msk [vmem:[%s2967_s22 + $0x80] sm:$0xff] %vm2285_vm12, %v2076_v31  ;;  %2613 = vcosq.f32 %v2269_v6 }
 0x27d   : > { %2615 = vsinq.f32 %v2269_v6 }
 0x289   : > { %v2614_v50 = vpop.eup %2613 }
 0x28a   : > { %v2616_v5 = vpop.eup %2615  ;;  %v2281_v41 = vxor.u32 2147483648, %v2614_v50 }
 0x28b   : > { %v2278_v42 = vxor.u32 2147483648, %v2616_v5 }
 0x28c   : > { %v2282_v35 = vsel %vm2280_vm2, %v2281_v41, %v2616_v5 }
 0x28d   : > { %v2279_v14 = vsel %vm2277_vm3, %v2614_v50, %v2278_v42 }
 0x28e   : > { %v2283_v19 = vsel %vm2276_vm4, %v2279_v14, %v2282_v35 }
 0x28f   : > { %v2284_v32 = vsel %vm2273_vm5, nan, %v2283_v19 }
 0x290   : > { %2304 = vst.msk [vmem:[%s2967_s22 + $0x90] sm:$0xff] %vm2285_vm12, %v2284_v32 }
 0x291 PF: > { %s12_s9 = sadd.s32 1, %s2627_s9  }
 0x292   : > { %p9_p4 = scmp.ge.s32.totalorder %s12_s9, 4  }
 0x294   :  { %11 = sbr.rel (!%p9_p4) target bundleno = 1 (0x1), region = 58 }

</bundles_post_ra>
